<compile_context>
chip_gen: v7x
topology: tpu7x:2x2x1
jax: 0.10.0
libtpu: 0.0.40
codegen_flags: <defaults>
</compile_context>

<pallas_src>
import functools

import jax
import jax.numpy as jnp
from jax.experimental import pallas as pl
from jax.experimental.pallas import tpu as pltpu


# ----------------------------------------------------------------------------
# Helpers
# ----------------------------------------------------------------------------
def _pad_dim(n):
    """Pad node count so tiles stay (8,128)-friendly; zero pad is exact here."""
    if n <= 128:
        return -(-n // 8) * 8
    return -(-n // 128) * 128


def _pick_tile(dim, prefs, want_multi=False):
    """Largest preferred tile dividing `dim` (optionally requiring >=2 tiles so
    the parallel axis can shard across v7x's two TensorCores); falls back to
    the full extent (only hit for small, already-padded dims)."""
    if want_multi:
        for t in prefs:
            if dim % t == 0 and dim // t >= 2:
                return t
    for t in prefs:
        if dim % t == 0:
            return t
    return dim


def _dtype_bytes(dt):
    return 2 if dt == jnp.bfloat16 else 4


# ----------------------------------------------------------------------------
# Pallas kernels
# ----------------------------------------------------------------------------
def _proj_kernel(xt_ref, wnT_ref, wsT_ref, bT_ref, zt_ref, st_ref, *, num_rel):
    """Transposed projection pass over one column (node) tile of X^T:

        S^T = Wself_sum^T @ X^T + b          (f32 output)
        Z_r^T = Wneigh_r^T @ X^T             (bf16 output, r = 0..R-1)

    Din fits a single block, so there is no contraction grid axis and no
    scratch accumulator; weight blocks are constant-index (VMEM resident).
    """
    xt = xt_ref[...]
    st_ref[...] = (jnp.dot(wsT_ref[...], xt, preferred_element_type=jnp.float32)
                   + bT_ref[...])
    for r in range(num_rel):  # small static unroll over relations
        zt_ref[r] = jnp.dot(wnT_ref[r], xt,
                            preferred_element_type=jnp.float32).astype(zt_ref.dtype)


def _agg_kernel(st_ref, zt_ref, at_ref, invd_ref, o_ref, acc_ref,
                *, num_rel, tk, apply_relu, z_resident):
    """Transposed hetero-SAGE aggregation for one destination-column tile:

        out^T[:, i] = S^T[:, i] + sum_r inv_deg_r[i] * sum_k Z_r^T[:, k] @ A_r^T[k, i]

    grid = (N/tm, N/tk); k (source-node contraction) is the last axis.
    A^T arrives as a raw {0,1} int8 mask (cast to bf16 in-kernel); the exact
    f32 1/deg mean normalization is applied per relation on the f32 partials.
    """
    k = pl.program_id(1)

    @pl.when(k == 0)
    def _():
        acc_ref[...] = st_ref[...]          # self term + bias (f32), no matmul

    acc = acc_ref[...]                      # single read per step
    for r in range(num_rel):
        if z_resident:
            start = pl.multiple_of(k * tk, tk)
            z_blk = zt_ref[r, :, pl.ds(start, tk)]
        else:
            z_blk = zt_ref[r]
        a_blk = at_ref[r].astype(z_blk.dtype)          # {0,1} int8 -> bf16, exact
        c = jnp.dot(z_blk, a_blk, preferred_element_type=jnp.float32)
        acc = acc + c * invd_ref[r]                    # exact f32 1/deg row scale
    acc_ref[...] = acc                      # single write per step

    @pl.when(k == pl.num_programs(1) - 1)
    def _():
        res = acc_ref[...]
        if apply_relu:
            res = jnp.maximum(res, 0.0)
        o_ref[...] = res.astype(o_ref.dtype)


def _cosine_kernel(u_ref, v_ref, o_ref):
    """score[e] = <u_e, v_e> / (max(||u_e||, eps) * max(||v_e||, eps)).

    Inputs are (D, TE): features on sublanes, edges on lanes -> the (1, TE)
    output is lane-dense. rsqrt on clamped squared norms matches the torch
    cosine_similarity eps semantics and runs on the EUP slot.
    """
    u = u_ref[...]
    v = v_ref[...]
    dot = jnp.sum(u * v, axis=0, keepdims=True)
    nu2 = jnp.sum(u * u, axis=0, keepdims=True)
    nv2 = jnp.sum(v * v, axis=0, keepdims=True)
    eps2 = 1e-16                                        # (1e-8)^2
    inv = jax.lax.rsqrt(jnp.maximum(nu2, eps2) * jnp.maximum(nv2, eps2))
    o_ref[...] = dot * inv


# ----------------------------------------------------------------------------
# Wrappers around pallas_call
# ----------------------------------------------------------------------------
def neighbor_projection(xt, wnT, wsT, bT):
    """Z^T (R, Dout, Np) bf16 and S^T (Dout, Np) f32 in one pass."""
    Din, Np = xt.shape
    R, Dout, _ = wnT.shape
    tn = _pick_tile(Np, (512, 256, 128), want_multi=True)
    grid = (Np // tn,)

    flops = 2 * (R + 1) * Np * Din * Dout
    bytes_acc = (Din * Np * 2 + (R + 1) * Din * Dout * 2
                 + R * Dout * Np * 2 + Dout * Np * 4)

    return pl.pallas_call(
        functools.partial(_proj_kernel, num_rel=R),
        out_shape=(jax.ShapeDtypeStruct((R, Dout, Np), jnp.bfloat16),
                   jax.ShapeDtypeStruct((Dout, Np), jnp.float32)),
        grid_spec=pltpu.PrefetchScalarGridSpec(
            num_scalar_prefetch=0,
            grid=grid,
            in_specs=[
                pl.BlockSpec((Din, tn), lambda j: (0, j)),        # X^T tile
                pl.BlockSpec((R, Dout, Din), lambda j: (0, 0, 0)),  # Wn^T resident
                pl.BlockSpec((Dout, Din), lambda j: (0, 0)),        # Wself_sum^T
                pl.BlockSpec((Dout, 1), lambda j: (0, 0)),          # bias^T
            ],
            out_specs=[
                pl.BlockSpec((R, Dout, tn), lambda j: (0, 0, j)),
                pl.BlockSpec((Dout, tn), lambda j: (0, j)),
            ],
        ),
        compiler_params=pltpu.CompilerParams(dimension_semantics=("parallel",)),
        cost_estimate=pl.CostEstimate(flops=int(flops), transcendentals=0,
                                      bytes_accessed=int(bytes_acc)),
    )(xt, wnT, wsT, bT)


def hetero_aggregate(st, zt, maskT, inv_deg, *, apply_relu, out_dtype):
    """out^T (Dout, Np) = S^T + sum_r (1/deg_r) * (Z_r^T @ mask_r^T)."""
    Dout, Np = st.shape
    R = maskT.shape[0]

    tm = _pick_tile(Np, (512, 256, 128), want_multi=True)    # dst tile (lanes)
    tk = _pick_tile(Np, (1024, 512, 256, 128))               # src (contraction)

    # Keep Z^T fully VMEM-resident when small (kills per-dst-tile Z re-reads on
    # the HBM-bound kernel); otherwise stream (R, Dout, tk) blocks.
    z_resident = (R * Dout * Np * 2) <= 8 * 1024 * 1024

    grid = (Np // tm, Np // tk)
    kernel = functools.partial(_agg_kernel, num_rel=R, tk=tk,
                               apply_relu=apply_relu, z_resident=z_resident)

    if z_resident:
        z_spec = pl.BlockSpec((R, Dout, Np), lambda i, k: (0, 0, 0))
    else:
        z_spec = pl.BlockSpec((R, Dout, tk), lambda i, k: (0, 0, k))

    # Rough VMEM footprint; only raise the scoped limit when actually needed
    # (v5e scoped default is 16 MiB; cap well under v7x's 64 MiB physical).
    out_b = _dtype_bytes(out_dtype)
    z_bufs = 1 if z_resident else 2
    z_block = R * Dout * (Np if z_resident else tk) * 2
    est = (2 * Dout * tm * 4 + z_bufs * z_block + 2 * R * tk * tm
           + 2 * R * tm * 4 + 2 * Dout * tm * out_b + Dout * tm * 4)
    vmem_limit = None if est < 12 * 1024 * 1024 else min(int(est * 1.5),
                                                         48 * 1024 * 1024)

    flops = 2 * R * Np * Np * Dout
    bytes_acc = (R * Np * Np
                 + R * Dout * Np * 2 * (1 if z_resident else Np // tm)
                 + Dout * Np * 4 + Dout * Np * out_b)

    return pl.pallas_call(
        kernel,
        out_shape=jax.ShapeDtypeStruct((Dout, Np), out_dtype),
        grid_spec=pltpu.PrefetchScalarGridSpec(
            num_scalar_prefetch=0,
            grid=grid,
            in_specs=[
                pl.BlockSpec((Dout, tm), lambda i, k: (0, i)),      # S^T (k-invariant)
                z_spec,                                             # Z^T
                pl.BlockSpec((R, tk, tm), lambda i, k: (0, k, i)),  # mask^T int8
                pl.BlockSpec((R, 1, tm), lambda i, k: (0, 0, i)),   # 1/deg (k-invariant)
            ],
            out_specs=pl.BlockSpec((Dout, tm), lambda i, k: (0, i)),
            scratch_shapes=[pltpu.VMEM((Dout, tm), jnp.float32)],
        ),
        compiler_params=pltpu.CompilerParams(
            dimension_semantics=("parallel", "arbitrary"),
            vmem_limit_bytes=vmem_limit),
        cost_estimate=pl.CostEstimate(flops=int(flops), transcendentals=0,
                                      bytes_accessed=int(bytes_acc)),
    )(st, zt, maskT, inv_deg)


def sage_layer(xt, maskT, inv_deg, wnT, wsT, bT, *, apply_relu, out_dtype):
    """One hetero-SAGE layer in transposed orientation (bf16 MXU, f32 accum)."""
    zt, st = neighbor_projection(xt, wnT, wsT, bT)
    return hetero_aggregate(st, zt, maskT, inv_deg,
                            apply_relu=apply_relu, out_dtype=out_dtype)


def cosine_scores(ht, src_idx, dst_idx):
    """cosine_similarity(h[src], h[dst]) per edge, (E,) f32. ht is (D, N)."""
    # TODO(synk): endpoint gather could move in-kernel (scalar-prefetched indices
    # + per-edge DMA) to avoid materializing u/v in HBM.
    D, _ = ht.shape
    E = src_idx.shape[0]
    u = jnp.take(ht, src_idx, axis=1)                    # (D, E) f32, no transpose
    v = jnp.take(ht, dst_idx, axis=1)
    e_pad = max(128, -(-E // 128) * 128)
    u = jnp.pad(u, ((0, 0), (0, e_pad - E)))
    v = jnp.pad(v, ((0, 0), (0, e_pad - E)))
    te = _pick_tile(e_pad, (2048, 1024, 512, 256, 128))

    out = pl.pallas_call(
        _cosine_kernel,
        out_shape=jax.ShapeDtypeStruct((1, e_pad), jnp.float32),
        grid=(e_pad // te,),
        in_specs=[
            pl.BlockSpec((D, te), lambda e: (0, e)),
            pl.BlockSpec((D, te), lambda e: (0, e)),
        ],
        out_specs=pl.BlockSpec((1, te), lambda e: (0, e)),
        compiler_params=pltpu.CompilerParams(dimension_semantics=("parallel",)),
    )(u, v)
    return out[0, :E]


# ----------------------------------------------------------------------------
# Model: DoubleSAGEcos
# ----------------------------------------------------------------------------
class DoubleSAGEcosPallas:
    IN_FEAT = 512
    HID_FEAT = 256
    OUT_FEAT = 64

    def __init__(self, rel_names, key):
        self.rel_names = list(rel_names)
        R = len(self.rel_names)
        k = jax.random.split(key, 4)

        def glorot(rng, shape):
            fan_in, fan_out = shape[-2], shape[-1]
            lim = jnp.sqrt(6.0 / (fan_in + fan_out))
            return jax.random.uniform(rng, shape, jnp.float32, -lim, lim)

        # layer 0: 512 -> 256, layer 1: 256 -> 64, per-relation params
        self.w_self0 = glorot(k[0], (R, self.IN_FEAT, self.HID_FEAT))
        self.w_neigh0 = glorot(k[1], (R, self.IN_FEAT, self.HID_FEAT))
        self.b0 = jnp.zeros((R, 1, self.HID_FEAT), jnp.float32)
        self.w_self1 = glorot(k[2], (R, self.HID_FEAT, self.OUT_FEAT))
        self.w_neigh1 = glorot(k[3], (R, self.HID_FEAT, self.OUT_FEAT))
        self.b1 = jnp.zeros((R, 1, self.OUT_FEAT), jnp.float32)

    @staticmethod
    def _layer_params(w_self, w_neigh, b):
        # HeteroGraphConv 'sum' aggregation: the self term sees the same X for
        # every relation -> pre-reduce sum_r Wself_r / sum_r b_r; transpose all
        # weights for the feature-major (Dout, N) kernel orientation.
        wsT = jnp.sum(w_self, axis=0).T.astype(jnp.bfloat16)            # (Dout, Din)
        wnT = jnp.transpose(w_neigh, (0, 2, 1)).astype(jnp.bfloat16)    # (R, Dout, Din)
        bT = jnp.sum(b, axis=0).T.astype(jnp.float32)                   # (Dout, 1)
        return wsT, wnT, bT

    def gnn(self, adj_mask, x):
        """adj_mask: (R, N, N) {0,1}, row i = destination node. x: (N, 512) f32.
        Returns h^T (64, N) f32 (feature-major, the cosine predictor's layout)."""
        N = x.shape[0]
        n_pad = _pad_dim(N)
        pad = n_pad - N

        # Exact mean-aggregator normalization kept in f32 and applied in-kernel.
        deg = jnp.maximum(jnp.sum(adj_mask.astype(jnp.float32), axis=-1), 1.0)
        inv_deg = jnp.pad((1.0 / deg)[:, None, :], ((0, 0), (0, 0), (0, pad)),
                          constant_values=1.0)                           # (R,1,Np)
        # Raw {0,1} mask, transposed (src on contraction axis, dst on lanes).
        maskT = jnp.pad(jnp.transpose(adj_mask, (0, 2, 1)).astype(jnp.int8),
                        ((0, 0), (0, pad), (0, pad)))                    # (R,Np,Np)
        xt = jnp.pad(x.astype(jnp.bfloat16).T, ((0, 0), (0, pad)))       # (512,Np)

        ws0, wn0, b0 = self._layer_params(self.w_self0, self.w_neigh0, self.b0)
        ws1, wn1, b1 = self._layer_params(self.w_self1, self.w_neigh1, self.b1)

        h0t = sage_layer(xt, maskT, inv_deg, wn0, ws0, b0,
                         apply_relu=True, out_dtype=jnp.bfloat16)        # (256,Np)
        h1t = sage_layer(h0t, maskT, inv_deg, wn1, ws1, b1,
                         apply_relu=False, out_dtype=jnp.float32)        # (64,Np)
        return h1t[:, :N]

    def __call__(self, pos_edges, neg_edges, adj_mask, x):
        ht = self.gnn(adj_mask, x)
        pos_score = cosine_scores(ht, pos_edges[0], pos_edges[1])
        neg_score = cosine_scores(ht, neg_edges[0], neg_edges[1])
        return pos_score, neg_score

    @property
    def n_layers(self):
        return (2,)


# ----------------------------------------------------------------------------
# Pure-JAX reference (f32) for a correctness sanity check
# ----------------------------------------------------------------------------
def _reference_scores(model, adj_mask, x, edges):
    mask = adj_mask.astype(jnp.float32)
    deg = jnp.maximum(jnp.sum(mask, axis=-1, keepdims=True), 1.0)
    adj = mask / deg

    def layer(h, w_self, w_neigh, b, relu):
        out = jnp.zeros((h.shape[0], w_self.shape[-1]), jnp.float32)
        for r in range(adj.shape[0]):
            out = out + h @ w_self[r] + (adj[r] @ h) @ w_neigh[r] + b[r]
        return jnp.maximum(out, 0.0) if relu else out

    h = layer(x, model.w_self0, model.w_neigh0, model.b0, True)
    h = layer(h, model.w_self1, model.w_neigh1, model.b1, False)
    u = h[edges[0]]
    v = h[edges[1]]
    nu = jnp.maximum(jnp.linalg.norm(u, axis=-1), 1e-8)
    nv = jnp.maximum(jnp.linalg.norm(v, axis=-1), 1e-8)
    return jnp.sum(u * v, axis=-1) / (nu * nv)


# ----------------------------------------------------------------------------
# Main
# ----------------------------------------------------------------------------
if __name__ == "__main__":
    key = jax.random.PRNGKey(0)
    k_x, k_adj, k_pos, k_neg, k_params = jax.random.split(key, 5)

    rel_names = ["rel_a", "rel_b"]
    N = 16          # nodes
    E_POS = 8       # positive edges
    E_NEG = 8       # negative edges

    x = jax.random.normal(k_x, (N, DoubleSAGEcosPallas.IN_FEAT), jnp.float32)
    adj_mask = (jax.random.uniform(k_adj, (len(rel_names), N, N)) < 0.3
                ).astype(jnp.int8)
    pos_edges = jax.random.randint(k_pos, (2, E_POS), 0, N)
    neg_edges = jax.random.randint(k_neg, (2, E_NEG), 0, N)

    model = DoubleSAGEcosPallas(rel_names, k_params)
    pos_score, neg_score = model(pos_edges, neg_edges, adj_mask, x)
    jax.block_until_ready((pos_score, neg_score))

    assert pos_score.shape == (E_POS,) and neg_score.shape == (E_NEG,)
    assert bool(jnp.all(jnp.isfinite(pos_score)))
    assert bool(jnp.all(jnp.isfinite(neg_score)))
    assert bool(jnp.all(jnp.abs(pos_score) <= 1.001))
    assert bool(jnp.all(jnp.abs(neg_score) <= 1.001))

    # Sanity-check against the pure-JAX f32 reference (bf16 matmul tolerance).
    ref_pos = _reference_scores(model, adj_mask, x, pos_edges)
    ref_neg = _reference_scores(model, adj_mask, x, neg_edges)
    assert bool(jnp.max(jnp.abs(pos_score - ref_pos)) < 0.15)
    assert bool(jnp.max(jnp.abs(neg_score - ref_neg)) < 0.15)

    print("KERNEL_OK")
</pallas_src>

<mosaic_0001>
module attributes {stable_mosaic.version = 11 : i64} {
  func.func @_proj_kernel(%arg0: i32, %arg1: memref<512x16xbf16, #tpu.memory_space<vmem>>, %arg2: memref<2x256x512xbf16, #tpu.memory_space<vmem>>, %arg3: memref<256x512xbf16, #tpu.memory_space<vmem>>, %arg4: memref<256x1xf32, #tpu.memory_space<vmem>>, %arg5: memref<2x256x16xbf16, #tpu.memory_space<vmem>>, %arg6: memref<256x16xf32, #tpu.memory_space<vmem>>) attributes {dimension_semantics = [#tpu.dimension_semantics<parallel>], iteration_bounds = array<i64: 1>, scalar_prefetch = 0 : i64, scratch_operands = 0 : i64, tpu.core_type = #tpu.core_type<tc>, window_params = [{transform_indices = @transform_0, window_bounds = array<i64: 512, 16>}, {pipeline_mode = #tpu.pipeline_mode<synchronous>, transform_indices = @transform_1, window_bounds = array<i64: 2, 256, 512>}, {pipeline_mode = #tpu.pipeline_mode<synchronous>, transform_indices = @transform_2, window_bounds = array<i64: 256, 512>}, {pipeline_mode = #tpu.pipeline_mode<synchronous>, transform_indices = @transform_3, window_bounds = array<i64: 256, 1>}, {transform_indices = @transform_4, window_bounds = array<i64: 2, 256, 16>}, {transform_indices = @transform_5, window_bounds = array<i64: 256, 16>}]} {
    %c0 = arith.constant 0 : index
    %c0_0 = arith.constant 0 : index
    %0 = vector.load %arg1[%c0, %c0_0] : memref<512x16xbf16, #tpu.memory_space<vmem>>, vector<512x16xbf16>
    %c0_1 = arith.constant 0 : index
    %c0_2 = arith.constant 0 : index
    %1 = vector.load %arg3[%c0_1, %c0_2] : memref<256x512xbf16, #tpu.memory_space<vmem>>, vector<256x512xbf16>
    %cst = arith.constant dense<0.000000e+00> : vector<256x16xf32>
    %2 = tpu.matmul %1, %0, %cst {dimension_numbers = #tpu.dot_dimension_numbers<[1], [0], [0], [1], [0, 0, 1, 1], [], []>} : vector<256x512xbf16>, vector<512x16xbf16>, vector<256x16xf32> -> vector<256x16xf32>
    %c0_3 = arith.constant 0 : index
    %c0_4 = arith.constant 0 : index
    %3 = vector.load %arg4[%c0_3, %c0_4] : memref<256x1xf32, #tpu.memory_space<vmem>>, vector<256x1xf32>
    %4 = vector.broadcast %3 : vector<256x1xf32> to vector<256x16xf32>
    %5 = arith.addf %2, %4 : vector<256x16xf32>
    %c0_5 = arith.constant 0 : index
    %c0_6 = arith.constant 0 : index
    %6 = vector.load %arg6[%c0_5, %c0_6] : memref<256x16xf32, #tpu.memory_space<vmem>>, vector<256x16xf32>
    tpu.vector_store %arg6[%c0_5, %c0_6], %5 {strides = array<i32>} : memref<256x16xf32, #tpu.memory_space<vmem>>, vector<256x16xf32>,
    %c0_7 = arith.constant 0 : index
    %c0_8 = arith.constant 0 : index
    %c0_9 = arith.constant 0 : index
    %7 = vector.load %arg2[%c0_7, %c0_8, %c0_9] : memref<2x256x512xbf16, #tpu.memory_space<vmem>>, vector<1x256x512xbf16>
    %8 = vector.shape_cast %7 : vector<1x256x512xbf16> to vector<256x512xbf16>
    %cst_10 = arith.constant dense<0.000000e+00> : vector<256x16xf32>
    %9 = tpu.matmul %8, %0, %cst_10 {dimension_numbers = #tpu.dot_dimension_numbers<[1], [0], [0], [1], [0, 0, 1, 1], [], []>} : vector<256x512xbf16>, vector<512x16xbf16>, vector<256x16xf32> -> vector<256x16xf32>
    %10 = arith.truncf %9 : vector<256x16xf32> to vector<256x16xbf16>
    %c0_11 = arith.constant 0 : index
    %c0_12 = arith.constant 0 : index
    %c0_13 = arith.constant 0 : index
    %11 = vector.load %arg5[%c0_11, %c0_12, %c0_13] : memref<2x256x16xbf16, #tpu.memory_space<vmem>>, vector<1x256x16xbf16>
    %12 = vector.shape_cast %11 : vector<1x256x16xbf16> to vector<256x16xbf16>
    %13 = vector.shape_cast %10 : vector<256x16xbf16> to vector<1x256x16xbf16>
    tpu.vector_store %arg5[%c0_11, %c0_12, %c0_13], %13 {strides = array<i32>} : memref<2x256x16xbf16, #tpu.memory_space<vmem>>, vector<1x256x16xbf16>,
    %c1 = arith.constant 1 : index
    %c0_14 = arith.constant 0 : index
    %c0_15 = arith.constant 0 : index
    %14 = vector.load %arg2[%c1, %c0_14, %c0_15] : memref<2x256x512xbf16, #tpu.memory_space<vmem>>, vector<1x256x512xbf16>
    %15 = vector.shape_cast %14 : vector<1x256x512xbf16> to vector<256x512xbf16>
    %cst_16 = arith.constant dense<0.000000e+00> : vector<256x16xf32>
    %16 = tpu.matmul %15, %0, %cst_16 {dimension_numbers = #tpu.dot_dimension_numbers<[1], [0], [0], [1], [0, 0, 1, 1], [], []>} : vector<256x512xbf16>, vector<512x16xbf16>, vector<256x16xf32> -> vector<256x16xf32>
    %17 = arith.truncf %16 : vector<256x16xf32> to vector<256x16xbf16>
    %c1_17 = arith.constant 1 : index
    %c0_18 = arith.constant 0 : index
    %c0_19 = arith.constant 0 : index
    %18 = vector.load %arg5[%c1_17, %c0_18, %c0_19] : memref<2x256x16xbf16, #tpu.memory_space<vmem>>, vector<1x256x16xbf16>
    %19 = vector.shape_cast %18 : vector<1x256x16xbf16> to vector<256x16xbf16>
    %20 = vector.shape_cast %17 : vector<256x16xbf16> to vector<1x256x16xbf16>
    tpu.vector_store %arg5[%c1_17, %c0_18, %c0_19], %20 {strides = array<i32>} : memref<2x256x16xbf16, #tpu.memory_space<vmem>>, vector<1x256x16xbf16>,
    return
  }
  func.func @transform_0(%arg0: i32) -> (i32, i32) {
    %c0_i32 = arith.constant 0 : i32
    %c0_i32_0 = arith.constant 0 : i32
    return %c0_i32, %arg0 : i32, i32
  }
  func.func @transform_1(%arg0: i32) -> (i32, i32, i32) {
    %c0_i32 = arith.constant 0 : i32
    %c0_i32_0 = arith.constant 0 : i32
    %c0_i32_1 = arith.constant 0 : i32
    %c0_i32_2 = arith.constant 0 : i32
    return %c0_i32, %c0_i32_0, %c0_i32_1 : i32, i32, i32
  }
  func.func @transform_2(%arg0: i32) -> (i32, i32) {
    %c0_i32 = arith.constant 0 : i32
    %c0_i32_0 = arith.constant 0 : i32
    %c0_i32_1 = arith.constant 0 : i32
    return %c0_i32, %c0_i32_0 : i32, i32
  }
  func.func @transform_3(%arg0: i32) -> (i32, i32) {
    %c0_i32 = arith.constant 0 : i32
    %c0_i32_0 = arith.constant 0 : i32
    %c0_i32_1 = arith.constant 0 : i32
    return %c0_i32, %c0_i32_0 : i32, i32
  }
  func.func @transform_4(%arg0: i32) -> (i32, i32, i32) {
    %c0_i32 = arith.constant 0 : i32
    %c0_i32_0 = arith.constant 0 : i32
    %c0_i32_1 = arith.constant 0 : i32
    return %c0_i32, %c0_i32_0, %arg0 : i32, i32, i32
  }
  func.func @transform_5(%arg0: i32) -> (i32, i32) {
    %c0_i32 = arith.constant 0 : i32
    %c0_i32_0 = arith.constant 0 : i32
    return %c0_i32, %arg0 : i32, i32
  }
}

</mosaic_0001>

<bundles_post_ra>
// kernel: tpu_custom_call.1
= control target key start
LH: loop header
LB: loop body
LE: loop exit
PB: predicated region body
PF: predicated region fallthrough
CT: control target
= control target key end

     0   :  { %11 = vsyncpa [#allocation3], 0  ;;  %s4341_s18 = smov [#allocation2]   ;;  %s5315_s0 = inlined_call_operand.vmem [shape: bf16[512,16], index: 0, kind: input, shape index: {}]   ;;  %s5316_s1 = inlined_call_operand.hbm [shape: bf16[2,256,512], index: 1, kind: input, shape index: {}]   ;;  %s5317_s2 = inlined_call_operand.vmem [shape: bf16[256,512], index: 2, kind: input, shape index: {}]   ;;  %s5318_s3 = inlined_call_operand.vmem [shape: f32[256,1], index: 3, kind: input, shape index: {}]   ;;  %s5319_s4 = inlined_call_operand.vmem [shape: bf16[2,256,16], index: 4, kind: output, shape index: {0}]   ;;  %s5320_s5 = inlined_call_operand.vmem [shape: f32[256,16], index: 5, kind: output, shape index: {1}]  }
   0x1   :  { %s19_s19 = sshll.u32 %s4341_s18, 4  ;;  %s4317_s22 = scalar_lea.hbm %s5316_s1, 16384  ;;  %s20_s19 = int_to_ptr.vmem [resolvable:$true] %s19_s19 }
   0x2   :  { %p4318_p0 = scmp.ne.s32.totalorder %s5316_s1, %s4317_s22  ;;  %p4321_p1 = scmp.lt.u32.totalorder %s4317_s22, %s5316_s1 }
   0x4   :  { %p4323_p2 = pnand %p4321_p1, %p4318_p0 }
   0x6   :  { %4326 = shalt.err (!%p4323_p2)
}
   0x7   :  { %s4327_s27 = scalar_lea.vmem %s20_s19, 16384  ;;  %p4332_p4 = scmp.lt.s32.totalorder %s20_s19, %s20_s19 }
   0x8   :  { %p4328_p3 = scmp.ne.s32.totalorder %s20_s19, %s4327_s27  ;;  %p4333_p5 = scmp.lt.s32.totalorder %s4327_s27, %s4327_s27 }
   0xa   :  { %p4334_p6 = por %p4333_p5, %p4332_p4 }
   0xc   :  { %p4335_p7 = pnand %p4334_p6, %p4328_p3 }
   0xe   :  { %4338 = shalt.err (!%p4335_p7)
}
   0xf   :  { %s4342_s28 = smov 256   ;;  %s4343_s29 = smov 16  }
  0x10   :  { %25 = dma.hbm_to_vmem [thread:$0]  %s5316_s1, 16384, %s20_s19, [#allocation3], %s4342_s28, %s4342_s28, %s4343_s29  }
  0x11   :  { %4339 = dma.done.wait [#allocation3], 16384  }
  0x12   :  { %4340 = vsyncadd [#allocation3], 4294950912  ;;  %v4344_v0 = vmov 0   ;;  %v4390_v1 = vld [vmem:[%s5315_s0 + $0x40] sm:$0xff]   ;;  %v4413_v5 = vld [vmem:[%s5315_s0 + $0x48] sm:$0xff]   ;;  %vm1188_vm0 = vcmask 130048  }
  0x13   :  { %4025 = vset.pattern.permute.xlu0 %v4344_v0  ;;  %4026 = vset.pattern.permute.xlu1 %v4344_v0  ;;  %v4395_v2 = vld [vmem:[%s5315_s0 + $0xc0] sm:$0xff]   ;;  %v4419_v6 = vld [vmem:[%s5315_s0 + $0xc8] sm:$0xff]   ;;  %v4437_v9 = vld [vmem:[%s5315_s0 + $0x50] sm:$0xff]   ;;  %vm2055_vm1 = vcmask 125952  }
  0x14   :  { %3349 = vmatprep.subr.bf16.mxu0 %v4390_v1  ;;  %v4401_v3 = vld [vmem:[%s5315_s0] sm:$0xff]   ;;  %3461 = vmatprep.subr.bf16.mxu1 %v4395_v2  ;;  %v4425_v7 = vld [vmem:[%s5315_s0 + $0x8] sm:$0xff]   ;;  %v4443_v10 = vld [vmem:[%s5315_s0 + $0xd0] sm:$0xff]  }
  0x15   :  { %v4407_v4 = vld [vmem:[%s5315_s0 + $0x80] sm:$0xff]   ;;  %3350 = vmatpush3.bf16.msra.mxu0 %v4401_v3  ;;  %v4431_v8 = vld [vmem:[%s5315_s0 + $0x88] sm:$0xff]   ;;  %v4449_v11 = vld [vmem:[%s5315_s0 + $0x10] sm:$0xff]  }
  0x16   :  { %3462 = vmatpush3.bf16.msra.mxu1 %v4407_v4  ;;  %3351 = vmatprep.subr.bf16.mxu0 %v4413_v5  ;;  %v4455_v12 = vld [vmem:[%s5315_s0 + $0x90] sm:$0xff]   ;;  %v4461_v13 = vld [vmem:[%s5315_s0 + $0x58] sm:$0xff]   ;;  %v4485_v17 = vld [vmem:[%s5315_s0 + $0x60] sm:$0xff]  }
  0x17   :  { %3463 = vmatprep.subr.bf16.mxu1 %v4419_v6  ;;  %v4467_v14 = vld [vmem:[%s5315_s0 + $0xd8] sm:$0xff]   ;;  %v4491_v18 = vld [vmem:[%s5315_s0 + $0xe0] sm:$0xff]   ;;  %v4509_v21 = vld [vmem:[%s5315_s0 + $0x68] sm:$0xff]  }
  0x18   :  { %v4473_v15 = vld [vmem:[%s5315_s0 + $0x18] sm:$0xff]   ;;  %v4497_v19 = vld [vmem:[%s5315_s0 + $0x20] sm:$0xff]   ;;  %v4515_v22 = vld [vmem:[%s5315_s0 + $0xe8] sm:$0xff]  }
  0x19   :  { %3352 = vmatpush3.bf16.msra.mxu0 %v4425_v7  ;;  %v4479_v16 = vld [vmem:[%s5315_s0 + $0x98] sm:$0xff]   ;;  %v4503_v20 = vld [vmem:[%s5315_s0 + $0xa0] sm:$0xff]   ;;  %v4521_v23 = vld [vmem:[%s5315_s0 + $0x28] sm:$0xff]  }
  0x1a   :  { %3464 = vmatpush3.bf16.msra.mxu1 %v4431_v8  ;;  %3353 = vmatprep.subr.bf16.mxu0 %v4437_v9  ;;  %v4527_v24 = vld [vmem:[%s5315_s0 + $0xa8] sm:$0xff]   ;;  %v4533_v25 = vld [vmem:[%s5315_s0 + $0x70] sm:$0xff]   ;;  %v4557_v29 = vld [vmem:[%s5315_s0 + $0x78] sm:$0xff]  }
  0x1b   :  { %3465 = vmatprep.subr.bf16.mxu1 %v4443_v10  ;;  %v4539_v26 = vld [vmem:[%s5315_s0 + $0xf0] sm:$0xff]   ;;  %v4563_v30 = vld [vmem:[%s5315_s0 + $0xf8] sm:$0xff]   ;;  %v162_v51 = vld [vmem:[%s5318_s3] sm:$0xff] }
  0x1c   :  { %v4545_v27 = vld [vmem:[%s5315_s0 + $0x30] sm:$0xff]   ;;  %v4569_v31 = vld [vmem:[%s5315_s0 + $0x38] sm:$0xff]   ;;  %196 = vperm.xlu0 %4025, %v162_v51   ;;  %v163_v54 = vld [vmem:[%s5318_s3 + $0x8] sm:$0xff] }
  0x1d   :  { %3354 = vmatpush3.bf16.msra.mxu0 %v4449_v11  ;;  %v4551_v28 = vld [vmem:[%s5315_s0 + $0xb0] sm:$0xff]   ;;  %v4575_v32 = vld [vmem:[%s5315_s0 + $0xb8] sm:$0xff]   ;;  %v166_v59 = vld [vmem:[%s5318_s3 + $0x20] sm:$0xff] }
  0x1e   :  { %3466 = vmatpush3.bf16.msra.mxu1 %v4455_v12  ;;  %3355 = vmatprep.subr.bf16.mxu0 %v4461_v13  ;;  %v4059_v33 = vld [vmem:[%s5317_s2] ss:$16 sps:$4 sm:$0xff]   ;;  %v4061_v34 = vld [vmem:[%s5317_s2 + $0x4] ss:$16 sps:$4 sm:$0xff]   ;;  %v4062_v35 = vld [vmem:[%s5317_s2 + $0x8] ss:$16 sps:$4 sm:$0xff]  }
  0x1f   :  { %3467 = vmatprep.subr.bf16.mxu1 %v4467_v14  ;;  %v4064_v36 = vld [vmem:[%s5317_s2 + $0xc] ss:$16 sps:$4 sm:$0xff]   ;;  %898 = vmatprep.mubr.bf16.mxu0 %v4061_v34  ;;  %v4065_v37 = vld [vmem:[%s5317_s2 + $0x24] ss:$16 sps:$4 sm:$0xff]   ;;  %v4069_v39 = vld [vmem:[%s5317_s2 + $0x20] ss:$16 sps:$4 sm:$0xff]  }
  0x20   :  { %1059 = vmatprep.mubr.bf16.mxu1 %v4064_v36  ;;  %v4067_v38 = vld [vmem:[%s5317_s2 + $0x2c] ss:$16 sps:$4 sm:$0xff]   ;;  %v4070_v40 = vld [vmem:[%s5317_s2 + $0x28] ss:$16 sps:$4 sm:$0xff]   ;;  %v4071_v41 = vld [vmem:[%s5317_s2 + $0x44] ss:$16 sps:$4 sm:$0xff]   ;;  %201 = vperm.xlu0 %4025, %v163_v54  }
  0x21   :  { %3356 = vmatpush3.bf16.msra.mxu0 %v4473_v15  ;;  %v4073_v42 = vld [vmem:[%s5317_s2 + $0x4c] ss:$16 sps:$4 sm:$0xff]   ;;  %v4075_v43 = vld [vmem:[%s5317_s2 + $0x40] ss:$16 sps:$4 sm:$0xff]   ;;  %v4076_v44 = vld [vmem:[%s5317_s2 + $0x48] ss:$16 sps:$4 sm:$0xff]  }
  0x22   :  { %3468 = vmatpush3.bf16.msra.mxu1 %v4479_v16  ;;  %3357 = vmatprep.subr.bf16.mxu0 %v4485_v17  ;;  %v4077_v45 = vld [vmem:[%s5317_s2 + $0x64] ss:$16 sps:$4 sm:$0xff]   ;;  %v4079_v46 = vld [vmem:[%s5317_s2 + $0x6c] ss:$16 sps:$4 sm:$0xff]   ;;  %v4081_v47 = vld [vmem:[%s5317_s2 + $0x60] ss:$16 sps:$4 sm:$0xff]  }
  0x23   :  { %3469 = vmatprep.subr.bf16.mxu1 %v4491_v18  ;;  %v4082_v48 = vld [vmem:[%s5317_s2 + $0x68] ss:$16 sps:$4 sm:$0xff]   ;;  %v4083_v49 = vld [vmem:[%s5317_s2 + $0x84] ss:$16 sps:$4 sm:$0xff]   ;;  %v4085_v50 = vld [vmem:[%s5317_s2 + $0x8c] ss:$16 sps:$4 sm:$0xff]  }
  0x24   :  { %v4087_v52 = vld [vmem:[%s5317_s2 + $0x80] ss:$16 sps:$4 sm:$0xff]   ;;  %v4088_v53 = vld [vmem:[%s5317_s2 + $0x88] ss:$16 sps:$4 sm:$0xff]   ;;  %v4089_v56 = vld [vmem:[%s5317_s2 + $0xa4] ss:$16 sps:$4 sm:$0xff]   ;;  %216 = vperm.xlu0 %4025, %v166_v59  }
  0x25   :  { %3358 = vmatpush3.bf16.msra.mxu0 %v4497_v19  ;;  %v164_v55 = vld [vmem:[%s5318_s3 + $0x10] sm:$0xff]  ;;  %v4091_v57 = vld [vmem:[%s5317_s2 + $0xac] ss:$16 sps:$4 sm:$0xff]   ;;  %v4094_v63 = vld [vmem:[%s5317_s2 + $0xa8] ss:$16 sps:$4 sm:$0xff]  }
  0x26   :  { %3470 = vmatpush3.bf16.msra.mxu1 %v4503_v20  ;;  %3359 = vmatprep.subr.bf16.mxu0 %v4509_v21  ;;  %v165_v58 = vld [vmem:[%s5318_s3 + $0x18] sm:$0xff]  ;;  %v4093_v60 = vld [vmem:[%s5317_s2 + $0xa0] ss:$16 sps:$4 sm:$0xff]   ;;  %v167_v61 = vld [vmem:[%s5318_s3 + $0x28] sm:$0xff] }
  0x27   :  { %3471 = vmatprep.subr.bf16.mxu1 %v4515_v22  ;;  %206 = vperm.xlu1 %4026, %v164_v55   ;;  %v168_v62 = vld [vmem:[%s5318_s3 + $0x30] sm:$0xff]  ;;  %v171_v34 = vld [vmem:[%s5318_s3 + $0x48] sm:$0xff] }
  0x28   :  { %v4095_v0 = vld [vmem:[%s5317_s2 + $0xc4] ss:$16 sps:$4 sm:$0xff]   ;;  %226 = vperm.xlu0 %4025, %v168_v62   ;;  %v179_v51 = vld [vmem:[%s5318_s3 + $0x88] sm:$0xff]  ;;  %v4117_v59 = vld [vmem:[%s5317_s2 + $0x120] ss:$16 sps:$4 sm:$0xff]  }
  0x29   :  { %3360 = vmatpush3.bf16.msra.mxu0 %v4521_v23  ;;  %v172_v36 = vld [vmem:[%s5318_s3 + $0x50] sm:$0xff]  ;;  %v4115_v55 = vld [vmem:[%s5317_s2 + $0x12c] ss:$16 sps:$4 sm:$0xff]  }
  0x2a   :  { %3472 = vmatpush3.bf16.msra.mxu1 %v4527_v24  ;;  %3361 = vmatprep.subr.bf16.mxu0 %v4533_v25  ;;  %v4113_v54 = vld [vmem:[%s5317_s2 + $0x124] ss:$16 sps:$4 sm:$0xff]  }
  0x2b   :  { %3473 = vmatprep.subr.bf16.mxu1 %v4539_v26  ;;  %211 = vperm.xlu1 %4026, %v165_v58   ;;  %v183_v58 = vld [vmem:[%s5318_s3 + $0xa8] sm:$0xff]  ;;  %v4119_v62 = vld [vmem:[%s5317_s2 + $0x144] ss:$16 sps:$4 sm:$0xff]  }
  0x2d   :  { %3362 = vmatpush3.bf16.msra.mxu0 %v4545_v27 }
  0x2e   :  { %3474 = vmatpush3.bf16.msra.mxu1 %v4551_v28  ;;  %3363 = vmatprep.subr.bf16.mxu0 %v4557_v29 }
  0x2f   :  { %3475 = vmatprep.subr.bf16.mxu1 %v4563_v30  ;;  %221 = vperm.xlu1 %4026, %v167_v61   ;;  %v184_v61 = vld [vmem:[%s5318_s3 + $0xb0] sm:$0xff] }
  0x31   :  { %3364 = vmatpush3.bf16.msra.mxu0 %v4569_v31 }
  0x32   :  { %3476 = vmatpush3.bf16.msra.mxu1 %v4575_v32  ;;  %3573 = vmatprep.subr.bf16.mxu0 %v4390_v1 }
  0x33   :  { %3685 = vmatprep.subr.bf16.mxu1 %v4395_v2 }
  0x34   :  { %899 = vmatmul.mubr.bf16.vlgmr.msra.gmra.mrb[0].mxu0 %v4059_v33  ;;  %v170_v33 = vld [vmem:[%s5318_s3 + $0x40] sm:$0xff] }
  0x35   :  { %1060 = vmatmul.mubr.bf16.vlgmr.msra.gmra.mrb[0].mxu1 %v4062_v35  ;;  %3574 = vmatpush3.bf16.msra.mxu0 %v4401_v3  ;;  %v4099_v35 = vld [vmem:[%s5317_s2 + $0xc0] ss:$16 sps:$4 sm:$0xff]  }
  0x36   :  { %3686 = vmatpush3.bf16.msra.mxu1 %v4407_v4  ;;  %906 = vmatprep.mubr.bf16.mxu0 %v4065_v37  ;;  %v4100_v37 = vld [vmem:[%s5317_s2 + $0xc8] ss:$16 sps:$4 sm:$0xff]  }
  0x37   :  { %1067 = vmatprep.mubr.bf16.mxu1 %v4067_v38  ;;  %3575 = vmatprep.subr.bf16.mxu0 %v4413_v5  ;;  %v4101_v38 = vld [vmem:[%s5317_s2 + $0xe4] ss:$16 sps:$4 sm:$0xff]  }
  0x38   :  { %3687 = vmatprep.subr.bf16.mxu1 %v4419_v6  ;;  %236 = vperm.xlu0 %4025, %v170_v33   ;;  %v4124_v33 = vld [vmem:[%s5317_s2 + $0x148] ss:$16 sps:$4 sm:$0xff]  }
  0x39   :  { %3576 = vmatpush3.bf16.msra.mxu0 %v4425_v7 }
  0x3a   :  { %3688 = vmatpush3.bf16.msra.mxu1 %v4431_v8  ;;  %3577 = vmatprep.subr.bf16.mxu0 %v4437_v9 }
  0x3b   :  { %3689 = vmatprep.subr.bf16.mxu1 %v4443_v10 }
  0x3c   :  { %907 = vmatmul.mubr.bf16.gmra.mrb[4].mxu0 %v4069_v39  ;;  %v4103_v39 = vld [vmem:[%s5317_s2 + $0xec] ss:$16 sps:$4 sm:$0xff]   ;;  %246 = vperm.xlu0 %4025, %v172_v36   ;;  %v188_v36 = vld [vmem:[%s5318_s3 + $0xd0] sm:$0xff] }
  0x3d   :  { %1068 = vmatmul.mubr.bf16.gmra.mrb[4].mxu1 %v4070_v40  ;;  %914 = vmatprep.mubr.bf16.mxu0 %v4071_v41  ;;  %v173_v40 = vld [vmem:[%s5318_s3 + $0x58] sm:$0xff]  ;;  %v174_v41 = vld [vmem:[%s5318_s3 + $0x60] sm:$0xff] }
  0x3e   :  { %1075 = vmatprep.mubr.bf16.mxu1 %v4073_v42  ;;  %3578 = vmatpush3.bf16.msra.mxu0 %v4449_v11  ;;  %v4105_v42 = vld [vmem:[%s5317_s2 + $0xe0] ss:$16 sps:$4 sm:$0xff]  }
  0x3f   :  { %3690 = vmatpush3.bf16.msra.mxu1 %v4455_v12  ;;  %3579 = vmatprep.subr.bf16.mxu0 %v4461_v13 }
  0x40   :  { %3691 = vmatprep.subr.bf16.mxu1 %v4467_v14  ;;  %256 = vperm.xlu0 %4025, %v174_v41   ;;  %v4129_v41 = vld [vmem:[%s5317_s2 + $0x160] ss:$16 sps:$4 sm:$0xff]  }
  0x42   :  { %3580 = vmatpush3.bf16.msra.mxu0 %v4473_v15 }
  0x43   :  { %3692 = vmatpush3.bf16.msra.mxu1 %v4479_v16  ;;  %3581 = vmatprep.subr.bf16.mxu0 %v4485_v17 }
  0x44   :  { %915 = vmatmul.mubr.bf16.gmra.mrb[8].mxu0 %v4075_v43  ;;  %3693 = vmatprep.subr.bf16.mxu1 %v4491_v18  ;;  %v4106_v43 = vld [vmem:[%s5317_s2 + $0xe8] ss:$16 sps:$4 sm:$0xff]  }
  0x45   :  { %1076 = vmatmul.mubr.bf16.gmra.mrb[8].mxu1 %v4076_v44  ;;  %922 = vmatprep.mubr.bf16.mxu0 %v4077_v45  ;;  %v175_v44 = vld [vmem:[%s5318_s3 + $0x68] sm:$0xff]  ;;  %v176_v45 = vld [vmem:[%s5318_s3 + $0x70] sm:$0xff] }
  0x46   :  { %1083 = vmatprep.mubr.bf16.mxu1 %v4079_v46  ;;  %3582 = vmatpush3.bf16.msra.mxu0 %v4497_v19  ;;  %v4107_v46 = vld [vmem:[%s5317_s2 + $0x104] ss:$16 sps:$4 sm:$0xff]  }
  0x47   :  { %3694 = vmatpush3.bf16.msra.mxu1 %v4503_v20  ;;  %3583 = vmatprep.subr.bf16.mxu0 %v4509_v21 }
  0x48   :  { %3695 = vmatprep.subr.bf16.mxu1 %v4515_v22  ;;  %266 = vperm.xlu0 %4025, %v176_v45   ;;  %v4133_v45 = vld [vmem:[%s5317_s2 + $0x18c] ss:$16 sps:$4 sm:$0xff]  }
  0x4a   :  { %3584 = vmatpush3.bf16.msra.mxu0 %v4521_v23 }
  0x4b   :  { %3696 = vmatpush3.bf16.msra.mxu1 %v4527_v24  ;;  %3585 = vmatprep.subr.bf16.mxu0 %v4533_v25 }
  0x4c   :  { %923 = vmatmul.mubr.bf16.gmra.mrb[12].mxu0 %v4081_v47  ;;  %3697 = vmatprep.subr.bf16.mxu1 %v4539_v26  ;;  %v4109_v47 = vld [vmem:[%s5317_s2 + $0x10c] ss:$16 sps:$4 sm:$0xff]  }
  0x4d   :  { %1084 = vmatmul.mubr.bf16.gmra.mrb[12].mxu1 %v4082_v48  ;;  %930 = vmatprep.mubr.bf16.mxu0 %v4083_v49  ;;  %v177_v48 = vld [vmem:[%s5318_s3 + $0x78] sm:$0xff]  ;;  %v178_v49 = vld [vmem:[%s5318_s3 + $0x80] sm:$0xff] }
  0x4e   :  { %1091 = vmatprep.mubr.bf16.mxu1 %v4085_v50  ;;  %3586 = vmatpush3.bf16.msra.mxu0 %v4545_v27  ;;  %v4111_v50 = vld [vmem:[%s5317_s2 + $0x100] ss:$16 sps:$4 sm:$0xff]  }
  0x4f   :  { %3698 = vmatpush3.bf16.msra.mxu1 %v4551_v28  ;;  %3587 = vmatprep.subr.bf16.mxu0 %v4557_v29 }
  0x50   :  { %3699 = vmatprep.subr.bf16.mxu1 %v4563_v30  ;;  %276 = vperm.xlu0 %4025, %v178_v49   ;;  %v4137_v49 = vld [vmem:[%s5317_s2 + $0x1a4] ss:$16 sps:$4 sm:$0xff]  }
  0x52   :  { %3588 = vmatpush3.bf16.msra.mxu0 %v4569_v31 }
  0x53   :  { %3700 = vmatpush3.bf16.msra.mxu1 %v4575_v32  ;;  %3797 = vmatprep.subr.bf16.mxu0 %v4390_v1  ;;  %v4097_v1 = vld [vmem:[%s5317_s2 + $0xcc] ss:$16 sps:$4 sm:$0xff]  }
  0x54   :  { %931 = vmatmul.mubr.bf16.gmra.mrb[16].mxu0 %v4087_v52  ;;  %3909 = vmatprep.subr.bf16.mxu1 %v4395_v2  ;;  %v169_v2 = vld [vmem:[%s5318_s3 + $0x38] sm:$0xff]  ;;  %v180_v52 = vld [vmem:[%s5318_s3 + $0x90] sm:$0xff] }
  0x55   :  { %1092 = vmatmul.mubr.bf16.gmra.mrb[16].mxu1 %v4088_v53  ;;  %938 = vmatprep.mubr.bf16.mxu0 %v4089_v56  ;;  %v4112_v53 = vld [vmem:[%s5317_s2 + $0x108] ss:$16 sps:$4 sm:$0xff]  }
  0x56   :  { %1099 = vmatprep.mubr.bf16.mxu1 %v4091_v57  ;;  %231 = vperm.xlu1 %4026, %v169_v2   ;;  %v181_v56 = vld [vmem:[%s5318_s3 + $0x98] sm:$0xff]  ;;  %v182_v57 = vld [vmem:[%s5318_s3 + $0xa0] sm:$0xff] }
  0x57   :  { %286 = vperm.xlu0 %4025, %v180_v52   ;;  %v4123_v2 = vld [vmem:[%s5317_s2 + $0x140] ss:$16 sps:$4 sm:$0xff]   ;;  %v4142_v52 = vld [vmem:[%s5317_s2 + $0x1a8] ss:$16 sps:$4 sm:$0xff]  }
  0x5a   :  { %241 = vperm.xlu1 %4026, %v171_v34   ;;  %v4125_v34 = vld [vmem:[%s5317_s2 + $0x164] ss:$16 sps:$4 sm:$0xff]  }
  0x5b   :  { %296 = vperm.xlu0 %4025, %v182_v57   ;;  %v4149_v57 = vld [vmem:[%s5317_s2 + $0x1e4] ss:$16 sps:$4 sm:$0xff]  }
  0x5c   :  { %939 = vmatmul.mubr.bf16.gmra.mrb[20].mxu0 %v4093_v60  ;;  %v4118_v60 = vld [vmem:[%s5317_s2 + $0x128] ss:$16 sps:$4 sm:$0xff]  }
  0x5d   :  { %1100 = vmatmul.mubr.bf16.gmra.mrb[20].mxu1 %v4094_v63  ;;  %946 = vmatprep.mubr.bf16.mxu0 %v4095_v0  ;;  %v4121_v63 = vld [vmem:[%s5317_s2 + $0x14c] ss:$16 sps:$4 sm:$0xff]  }
  0x5e   :  { %1107 = vmatprep.mubr.bf16.mxu1 %v4097_v1  ;;  %251 = vperm.xlu1 %4026, %v173_v40   ;;  %v185_v0 = vld [vmem:[%s5318_s3 + $0xb8] sm:$0xff]  ;;  %v186_v1 = vld [vmem:[%s5318_s3 + $0xc0] sm:$0xff]  ;;  %v191_v40 = vld [vmem:[%s5318_s3 + $0xe8] sm:$0xff] }
  0x5f   :  { %306 = vperm.xlu0 %4025, %v184_v61   ;;  %v4157_v61 = vld [vmem:[#allocation2 + $0x4] ss:$16 sps:$4 sm:$0xff]  }
  0x62   :  { %261 = vperm.xlu1 %4026, %v175_v44   ;;  %v4131_v44 = vld [vmem:[%s5317_s2 + $0x184] ss:$16 sps:$4 sm:$0xff]  }
  0x63   :  { %316 = vperm.xlu0 %4025, %v186_v1   ;;  %v4161_v1 = vld [vmem:[#allocation2 + $0x24] ss:$16 sps:$4 sm:$0xff]  }
  0x64   :  { %947 = vmatmul.mubr.bf16.gmra.mrb[24].mxu0 %v4099_v35  ;;  %v187_v35 = vld [vmem:[%s5318_s3 + $0xc8] sm:$0xff] }
  0x65   :  { %1108 = vmatmul.mubr.bf16.gmra.mrb[24].mxu1 %v4100_v37  ;;  %954 = vmatprep.mubr.bf16.mxu0 %v4101_v38  ;;  %v4127_v37 = vld [vmem:[%s5317_s2 + $0x16c] ss:$16 sps:$4 sm:$0xff]  }
  0x66   :  { %1115 = vmatprep.mubr.bf16.mxu1 %v4103_v39  ;;  %271 = vperm.xlu1 %4026, %v177_v48   ;;  %v189_v38 = vld [vmem:[%s5318_s3 + $0xd8] sm:$0xff]  ;;  %v190_v39 = vld [vmem:[%s5318_s3 + $0xe0] sm:$0xff] }
  0x67   :  { %326 = vperm.xlu0 %4025, %v188_v36   ;;  %v4136_v48 = vld [vmem:[%s5317_s2 + $0x188] ss:$16 sps:$4 sm:$0xff]   ;;  %v4169_v36 = vld [vmem:[#allocation2 + $0x4c] ss:$16 sps:$4 sm:$0xff]  }
  0x6a   :  { %281 = vperm.xlu1 %4026, %v179_v51   ;;  %v4141_v51 = vld [vmem:[%s5317_s2 + $0x1a0] ss:$16 sps:$4 sm:$0xff]  }
  0x6b   :  { %336 = vperm.xlu0 %4025, %v190_v39   ;;  %v4219_v39 = vld [vmem:[#allocation2 + $0x140] ss:$16 sps:$4 sm:$0xff]  }
  0x6c   :  { %955 = vmatmul.mubr.bf16.gmra.mrb[28].mxu0 %v4105_v42  ;;  %v192_v42 = vld [vmem:[%s5318_s3 + $0xf0] sm:$0xff] }
  0x6d   :  { %1116 = vmatmul.mubr.bf16.gmra.mrb[28].mxu1 %v4106_v43  ;;  %962 = vmatprep.mubr.bf16.mxu0 %v4107_v46  ;;  %v4130_v43 = vld [vmem:[%s5317_s2 + $0x168] ss:$16 sps:$4 sm:$0xff]  }
  0x6e   :  { %1123 = vmatprep.mubr.bf16.mxu1 %v4109_v47  ;;  %291 = vperm.xlu1 %4026, %v181_v56   ;;  %v193_v46 = vld [vmem:[%s5318_s3 + $0xf8] sm:$0xff]  ;;  %v4135_v47 = vld [vmem:[%s5317_s2 + $0x180] ss:$16 sps:$4 sm:$0xff]  }
  0x6f   :  { %346 = vperm.xlu0 %4025, %v192_v42   ;;  %v4148_v56 = vld [vmem:[%s5317_s2 + $0x1c8] ss:$16 sps:$4 sm:$0xff]   ;;  %v4221_v42 = vld [vmem:[#allocation2 + $0x164] ss:$16 sps:$4 sm:$0xff]  }
  0x72   :  { %301 = vperm.xlu1 %4026, %v183_v58   ;;  %v4151_v58 = vld [vmem:[%s5317_s2 + $0x1ec] ss:$16 sps:$4 sm:$0xff]  }
  0x74   :  { %963 = vmatmul.mubr.bf16.gmra.mrb[32].mxu0 %v4111_v50  ;;  %v4139_v50 = vld [vmem:[%s5317_s2 + $0x1ac] ss:$16 sps:$4 sm:$0xff]  }
  0x75   :  { %1124 = vmatmul.mubr.bf16.gmra.mrb[32].mxu1 %v4112_v53  ;;  %970 = vmatprep.mubr.bf16.mxu0 %v4113_v54  ;;  %v4143_v53 = vld [vmem:[%s5317_s2 + $0x1c4] ss:$16 sps:$4 sm:$0xff]   ;;  %v4145_v54 = vld [vmem:[%s5317_s2 + $0x1cc] ss:$16 sps:$4 sm:$0xff]  }
  0x76   :  { %1131 = vmatprep.mubr.bf16.mxu1 %v4115_v55  ;;  %311 = vperm.xlu1 %4026, %v185_v0   ;;  %v4147_v55 = vld [vmem:[%s5317_s2 + $0x1c0] ss:$16 sps:$4 sm:$0xff]   ;;  %v4158_v0 = vld [vmem:[#allocation2 + $0x8] ss:$16 sps:$4 sm:$0xff]  }
  0x7a   :  { %321 = vperm.xlu1 %4026, %v187_v35   ;;  %v4167_v35 = vld [vmem:[#allocation2 + $0x44] ss:$16 sps:$4 sm:$0xff]  }
  0x7c   :  { %971 = vmatmul.mubr.bf16.gmra.mrb[36].mxu0 %v4117_v59  ;;  %v4153_v59 = vld [vmem:[%s5317_s2 + $0x1e0] ss:$16 sps:$4 sm:$0xff]  }
  0x7d   :  { %1132 = vmatmul.mubr.bf16.gmra.mrb[36].mxu1 %v4118_v60  ;;  %978 = vmatprep.mubr.bf16.mxu0 %v4119_v62  ;;  %v4154_v60 = vld [vmem:[%s5317_s2 + $0x1e8] ss:$16 sps:$4 sm:$0xff]   ;;  %v4160_v62 = vld [vmem:[#allocation2 + $0xc] ss:$16 sps:$4 sm:$0xff]  }
  0x7e   :  { %1139 = vmatprep.mubr.bf16.mxu1 %v4121_v63  ;;  %331 = vperm.xlu1 %4026, %v189_v38   ;;  %v4155_v63 = vld [vmem:[#allocation2] ss:$16 sps:$4 sm:$0xff]   ;;  %v4217_v38 = vld [vmem:[#allocation2 + $0x14c] ss:$16 sps:$4 sm:$0xff]  }
  0x82   :  { %341 = vperm.xlu1 %4026, %v191_v40   ;;  %v4220_v40 = vld [vmem:[#allocation2 + $0x148] ss:$16 sps:$4 sm:$0xff]  }
  0x84   :  { %979 = vmatmul.mubr.bf16.gmra.mrb[40].mxu0 %v4123_v2  ;;  %v4163_v2 = vld [vmem:[#allocation2 + $0x2c] ss:$16 sps:$4 sm:$0xff]  }
  0x85   :  { %1140 = vmatmul.mubr.bf16.gmra.mrb[40].mxu1 %v4124_v33  ;;  %986 = vmatprep.mubr.bf16.mxu0 %v4125_v34  ;;  %v4165_v33 = vld [vmem:[#allocation2 + $0x20] ss:$16 sps:$4 sm:$0xff]   ;;  %v4166_v34 = vld [vmem:[#allocation2 + $0x28] ss:$16 sps:$4 sm:$0xff]  }
  0x86   :  { %1147 = vmatprep.mubr.bf16.mxu1 %v4127_v37  ;;  %351 = vperm.xlu1 %4026, %v193_v46   ;;  %v4215_v37 = vld [vmem:[#allocation2 + $0x144] ss:$16 sps:$4 sm:$0xff]   ;;  %v1266_v46 = vld [vmem:[#allocation2 + $0x168] sm:$0xff] }
  0x8c   :  { %987 = vmatmul.mubr.bf16.gmra.mrb[44].mxu0 %v4129_v41 }
  0x8d   :  { %1148 = vmatmul.mubr.bf16.gmra.mrb[44].mxu1 %v4130_v43  ;;  %994 = vmatprep.mubr.bf16.mxu0 %v4131_v44  ;;  %v4223_v43 = vld [vmem:[#allocation2 + $0x16c] ss:$16 sps:$4 sm:$0xff]   ;;  %v1265_v44 = vld [vmem:[#allocation2 + $0x160] sm:$0xff] }
  0x8e   :  { %1155 = vmatprep.mubr.bf16.mxu1 %v4133_v45  ;;  %v1267_v45 = vld [vmem:[#allocation2 + $0x170] sm:$0xff] }
  0x94   :  { %995 = vmatmul.mubr.bf16.gmra.mrb[48].mxu0 %v4135_v47  ;;  %v1268_v47 = vld [vmem:[#allocation2 + $0x178] sm:$0xff] }
  0x95   :  { %1156 = vmatmul.mubr.bf16.gmra.mrb[48].mxu1 %v4136_v48  ;;  %1002 = vmatprep.mubr.bf16.mxu0 %v4137_v49 }
  0x96   :  { %1163 = vmatprep.mubr.bf16.mxu1 %v4139_v50 }
  0x9b   :  { %v197_v41 = vpop.permute.xlu0 %196 }
  0x9c   :  { %1003 = vmatmul.mubr.bf16.gmra.mrb[52].mxu0 %v4141_v51 }
  0x9d   :  { %1164 = vmatmul.mubr.bf16.gmra.mrb[52].mxu1 %v4142_v52  ;;  %1010 = vmatprep.mubr.bf16.mxu0 %v4143_v53  ;;  %v3105_v53 = vcombine.low %v1265_v44, %v1267_v45  ;;  %v4233_v45 = vld [vmem:[#allocation2 + $0x1c4] ss:$16 sps:$4 sm:$0xff]  }
  0x9e   :  { %1171 = vmatprep.mubr.bf16.mxu1 %v4145_v54 }
  0x9f   :  { %v202_v50 = vpop.permute.xlu0 %201 }
  0xa4   :  { %1011 = vmatmul.mubr.bf16.gmra.mrb[56].mxu0 %v4147_v55 }
  0xa5   :  { %1172 = vmatmul.mubr.bf16.gmra.mrb[56].mxu1 %v4148_v56  ;;  %1018 = vmatprep.mubr.bf16.mxu0 %v4149_v57  ;;  %v3107_v57 = vcombine.low %v1266_v46, %v1268_v47 }
  0xa6   :  { %1179 = vmatprep.mubr.bf16.mxu1 %v4151_v58  ;;  %v207_v48 = vpop.permute.xlu1 %206  ;;  %v4225_v58 = vld [vmem:[#allocation2 + $0x184] ss:$16 sps:$4 sm:$0xff]  }
  0xac   :  { %1019 = vmatmul.mubr.bf16.gmra.mrb[60].mxu0 %v4153_v59 }
  0xad   :  { %1180 = vmatmul.mubr.bf16.gmra.mrb[60].mxu1 %v4154_v60  ;;  %1637 = vmatprep.mubr.bf16.mxu0 %v4157_v61 }
  0xae   :  { %1798 = vmatprep.mubr.bf16.mxu1 %v4160_v62  ;;  %v4227_v62 = vld [vmem:[#allocation2 + $0x18c] ss:$16 sps:$4 sm:$0xff]  }
  0xb4   :  { %1638 = vmatmul.mubr.bf16.vlgmr.msra.gmra.mrb[64].mxu0 %v4155_v63 }
  0xb5   :  { %1799 = vmatmul.mubr.bf16.vlgmr.msra.gmra.mrb[64].mxu1 %v4158_v0  ;;  %3798 = vmatpush3.bf16.msra.mxu0 %v4401_v3  ;;  %v4171_v3 = vld [vmem:[#allocation2 + $0x40] ss:$16 sps:$4 sm:$0xff]  }
  0xb6   :  { %3910 = vmatpush3.bf16.msra.mxu1 %v4407_v4  ;;  %1645 = vmatprep.mubr.bf16.mxu0 %v4161_v1  ;;  %v4172_v4 = vld [vmem:[#allocation2 + $0x48] ss:$16 sps:$4 sm:$0xff]  }
  0xb7   :  { %1806 = vmatprep.mubr.bf16.mxu1 %v4163_v2  ;;  %3799 = vmatprep.subr.bf16.mxu0 %v4413_v5  ;;  %v4173_v5 = vld [vmem:[#allocation2 + $0x64] ss:$16 sps:$4 sm:$0xff]  }
  0xb8   :  { %3911 = vmatprep.subr.bf16.mxu1 %v4419_v6  ;;  %v4175_v6 = vld [vmem:[#allocation2 + $0x6c] ss:$16 sps:$4 sm:$0xff]  }
  0xb9   :  { %3800 = vmatpush3.bf16.msra.mxu0 %v4425_v7  ;;  %v4177_v7 = vld [vmem:[#allocation2 + $0x60] ss:$16 sps:$4 sm:$0xff]  }
  0xba   :  { %3912 = vmatpush3.bf16.msra.mxu1 %v4431_v8  ;;  %3801 = vmatprep.subr.bf16.mxu0 %v4437_v9  ;;  %v4178_v8 = vld [vmem:[#allocation2 + $0x68] ss:$16 sps:$4 sm:$0xff]   ;;  %v4179_v9 = vld [vmem:[#allocation2 + $0x84] ss:$16 sps:$4 sm:$0xff]  }
  0xbb   :  { %3913 = vmatprep.subr.bf16.mxu1 %v4443_v10  ;;  %v4181_v10 = vld [vmem:[#allocation2 + $0x8c] ss:$16 sps:$4 sm:$0xff]  }
  0xbc   :  { %1646 = vmatmul.mubr.bf16.gmra.mrb[68].mxu0 %v4165_v33 }
  0xbd   :  { %1807 = vmatmul.mubr.bf16.gmra.mrb[68].mxu1 %v4166_v34  ;;  %1653 = vmatprep.mubr.bf16.mxu0 %v4167_v35  ;;  %v1269_v35 = vld [vmem:[#allocation2 + $0x180] sm:$0xff] }
  0xbe   :  { %1814 = vmatprep.mubr.bf16.mxu1 %v4169_v36  ;;  %3802 = vmatpush3.bf16.msra.mxu0 %v4449_v11  ;;  %v4183_v11 = vld [vmem:[#allocation2 + $0x80] ss:$16 sps:$4 sm:$0xff]  }
  0xbf   :  { %3914 = vmatpush3.bf16.msra.mxu1 %v4455_v12  ;;  %3803 = vmatprep.subr.bf16.mxu0 %v4461_v13  ;;  %v4184_v12 = vld [vmem:[#allocation2 + $0x88] ss:$16 sps:$4 sm:$0xff]   ;;  %v4185_v13 = vld [vmem:[#allocation2 + $0xa4] ss:$16 sps:$4 sm:$0xff]  }
  0xc0   :  { %3915 = vmatprep.subr.bf16.mxu1 %v4467_v14  ;;  %v4187_v14 = vld [vmem:[#allocation2 + $0xac] ss:$16 sps:$4 sm:$0xff]   ;;  %v1271_v36 = vld [vmem:[#allocation2 + $0x190] sm:$0xff] }
  0xc2   :  { %3804 = vmatpush3.bf16.msra.mxu0 %v4473_v15  ;;  %v4189_v15 = vld [vmem:[#allocation2 + $0xa0] ss:$16 sps:$4 sm:$0xff]  }
  0xc3   :  { %3916 = vmatpush3.bf16.msra.mxu1 %v4479_v16  ;;  %3805 = vmatprep.subr.bf16.mxu0 %v4485_v17  ;;  %v4190_v16 = vld [vmem:[#allocation2 + $0xa8] ss:$16 sps:$4 sm:$0xff]   ;;  %v4191_v17 = vld [vmem:[#allocation2 + $0xc4] ss:$16 sps:$4 sm:$0xff]  }
  0xc4   :  { %1654 = vmatmul.mubr.bf16.gmra.mrb[72].mxu0 %v4171_v3  ;;  %3917 = vmatprep.subr.bf16.mxu1 %v4491_v18  ;;  %v4193_v18 = vld [vmem:[#allocation2 + $0xcc] ss:$16 sps:$4 sm:$0xff]  }
  0xc5   :  { %1815 = vmatmul.mubr.bf16.gmra.mrb[72].mxu1 %v4172_v4  ;;  %1661 = vmatprep.mubr.bf16.mxu0 %v4173_v5  ;;  %v1270_v3 = vld [vmem:[#allocation2 + $0x188] sm:$0xff]  ;;  %v1272_v4 = vld [vmem:[#allocation2 + $0x198] sm:$0xff] }
  0xc6   :  { %1822 = vmatprep.mubr.bf16.mxu1 %v4175_v6  ;;  %3806 = vmatpush3.bf16.msra.mxu0 %v4497_v19  ;;  %v4195_v19 = vld [vmem:[#allocation2 + $0xc0] ss:$16 sps:$4 sm:$0xff]  }
  0xc7   :  { %3918 = vmatpush3.bf16.msra.mxu1 %v4503_v20  ;;  %3807 = vmatprep.subr.bf16.mxu0 %v4509_v21  ;;  %v4196_v20 = vld [vmem:[#allocation2 + $0xc8] ss:$16 sps:$4 sm:$0xff]   ;;  %v4197_v21 = vld [vmem:[#allocation2 + $0xe4] ss:$16 sps:$4 sm:$0xff]  }
  0xc8   :  { %3919 = vmatprep.subr.bf16.mxu1 %v4515_v22  ;;  %v4199_v22 = vld [vmem:[#allocation2 + $0xec] ss:$16 sps:$4 sm:$0xff]  }
  0xca   :  { %3808 = vmatpush3.bf16.msra.mxu0 %v4521_v23  ;;  %v4201_v23 = vld [vmem:[#allocation2 + $0xe0] ss:$16 sps:$4 sm:$0xff]  }
  0xcb   :  { %3920 = vmatpush3.bf16.msra.mxu1 %v4527_v24  ;;  %3809 = vmatprep.subr.bf16.mxu0 %v4533_v25  ;;  %v4202_v24 = vld [vmem:[#allocation2 + $0xe8] ss:$16 sps:$4 sm:$0xff]   ;;  %v4203_v25 = vld [vmem:[#allocation2 + $0x104] ss:$16 sps:$4 sm:$0xff]  }
  0xcc   :  { %1662 = vmatmul.mubr.bf16.gmra.mrb[76].mxu0 %v4177_v7  ;;  %3921 = vmatprep.subr.bf16.mxu1 %v4539_v26  ;;  %v4205_v26 = vld [vmem:[#allocation2 + $0x10c] ss:$16 sps:$4 sm:$0xff]   ;;  %v212_v7 = vpop.permute.xlu1 %211 }
  0xcd   :  { %1823 = vmatmul.mubr.bf16.gmra.mrb[76].mxu1 %v4178_v8  ;;  %1669 = vmatprep.mubr.bf16.mxu0 %v4179_v9 }
  0xce   :  { %1830 = vmatprep.mubr.bf16.mxu1 %v4181_v10  ;;  %3810 = vmatpush3.bf16.msra.mxu0 %v4545_v27  ;;  %v4207_v27 = vld [vmem:[#allocation2 + $0x100] ss:$16 sps:$4 sm:$0xff]   ;;  %v3109_v10 = vcombine.low %v1269_v35, %v1271_v36 }
  0xcf   :  { %3922 = vmatpush3.bf16.msra.mxu1 %v4551_v28  ;;  %3811 = vmatprep.subr.bf16.mxu0 %v4557_v29  ;;  %v4208_v28 = vld [vmem:[#allocation2 + $0x108] ss:$16 sps:$4 sm:$0xff]   ;;  %v4209_v29 = vld [vmem:[#allocation2 + $0x124] ss:$16 sps:$4 sm:$0xff]  }
  0xd0   :  { %3923 = vmatprep.subr.bf16.mxu1 %v4563_v30  ;;  %v4211_v30 = vld [vmem:[#allocation2 + $0x12c] ss:$16 sps:$4 sm:$0xff]  }
  0xd2   :  { %3812 = vmatpush3.bf16.msra.mxu0 %v4569_v31  ;;  %v4213_v31 = vld [vmem:[#allocation2 + $0x120] ss:$16 sps:$4 sm:$0xff]  }
  0xd3   :  { %3924 = vmatpush3.bf16.msra.mxu1 %v4575_v32  ;;  %v4214_v32 = vld [vmem:[#allocation2 + $0x128] ss:$16 sps:$4 sm:$0xff]  }
  0xd4   :  { %1670 = vmatmul.mubr.bf16.gmra.mrb[80].mxu0 %v4183_v11 }
  0xd5   :  { %1831 = vmatmul.mubr.bf16.gmra.mrb[80].mxu1 %v4184_v12  ;;  %1677 = vmatprep.mubr.bf16.mxu0 %v4185_v13 }
  0xd6   :  { %1838 = vmatprep.mubr.bf16.mxu1 %v4187_v14  ;;  %v3111_v14 = vcombine.low %v1270_v3, %v1272_v4  ;;  %v4237_v3 = vld [vmem:[#allocation2 + $0x1e4] ss:$16 sps:$4 sm:$0xff]  }
  0xdc   :  { %1678 = vmatmul.mubr.bf16.gmra.mrb[84].mxu0 %v4189_v15  ;;  %v4229_v15 = vld [vmem:[#allocation2 + $0x1a4] ss:$16 sps:$4 sm:$0xff]  }
  0xdd   :  { %1839 = vmatmul.mubr.bf16.gmra.mrb[84].mxu1 %v4190_v16  ;;  %1685 = vmatprep.mubr.bf16.mxu0 %v4191_v17 }
  0xde   :  { %1846 = vmatprep.mubr.bf16.mxu1 %v4193_v18 }
  0xe4   :  { %1686 = vmatmul.mubr.bf16.gmra.mrb[88].mxu0 %v4195_v19  ;;  %v4231_v19 = vld [vmem:[#allocation2 + $0x1ac] ss:$16 sps:$4 sm:$0xff]  }
  0xe5   :  { %1847 = vmatmul.mubr.bf16.gmra.mrb[88].mxu1 %v4196_v20  ;;  %1693 = vmatprep.mubr.bf16.mxu0 %v4197_v21 }
  0xe6   :  { %1854 = vmatprep.mubr.bf16.mxu1 %v4199_v22 }
  0xec   :  { %1694 = vmatmul.mubr.bf16.gmra.mrb[92].mxu0 %v4201_v23 }
  0xed   :  { %1855 = vmatmul.mubr.bf16.gmra.mrb[92].mxu1 %v4202_v24  ;;  %1701 = vmatprep.mubr.bf16.mxu0 %v4203_v25 }
  0xee   :  { %1862 = vmatprep.mubr.bf16.mxu1 %v4205_v26  ;;  %v1273_v26 = vld [vmem:[#allocation2 + $0x1a0] sm:$0xff] }
  0xf4   :  { %1702 = vmatmul.mubr.bf16.gmra.mrb[96].mxu0 %v4207_v27  ;;  %v1275_v27 = vld [vmem:[#allocation2 + $0x1b0] sm:$0xff] }
  0xf5   :  { %1863 = vmatmul.mubr.bf16.gmra.mrb[96].mxu1 %v4208_v28  ;;  %1709 = vmatprep.mubr.bf16.mxu0 %v4209_v29  ;;  %v217_v28 = vpop.permute.xlu0 %216  ;;  %v1274_v29 = vld [vmem:[#allocation2 + $0x1a8] sm:$0xff] }
  0xf6   :  { %1870 = vmatprep.mubr.bf16.mxu1 %v4211_v30  ;;  %v1276_v30 = vld [vmem:[#allocation2 + $0x1b8] sm:$0xff] }
  0xf7   :  { %v3115_v44 = vcombine.low %v1274_v29, %v1276_v30  ;;  %v4243_v29 = vld [vmem:[#allocation2 + $0x204] ss:$16 sps:$4 sm:$0xff]  }
  0xfc   :  { %1710 = vmatmul.mubr.bf16.gmra.mrb[100].mxu0 %v4213_v31 }
  0xfd   :  { %1871 = vmatmul.mubr.bf16.gmra.mrb[100].mxu1 %v4214_v32  ;;  %1717 = vmatprep.mubr.bf16.mxu0 %v4215_v37  ;;  %v222_v37 = vpop.permute.xlu1 %221 }
  0xfe   :  { %1878 = vmatprep.mubr.bf16.mxu1 %v4217_v38 }
 0x104   :  { %1718 = vmatmul.mubr.bf16.gmra.mrb[104].mxu0 %v4219_v39 }
 0x105   :  { %1879 = vmatmul.mubr.bf16.gmra.mrb[104].mxu1 %v4220_v40  ;;  %1725 = vmatprep.mubr.bf16.mxu0 %v4221_v42  ;;  %v3113_v40 = vcombine.low %v1273_v26, %v1275_v27 }
 0x106   :  { %1886 = vmatprep.mubr.bf16.mxu1 %v4223_v43 }
 0x107   :  { %v3365_v49 = vpop.f32.mrb[0].mxu0 }
 0x108   :  { %v3477_v51 = vpop.f32.mrb[0].mxu1  ;;  %v3366_v52 = vpop.f32.mrb[1].mxu0 }
 0x109   :  { %v3367_v54 = vadd.f32 %v3366_v52, %v3365_v49  ;;  %v3478_v55 = vpop.f32.mrb[1].mxu1  ;;  %v3368_v56 = vpop.f32.mrb[2].mxu0  ;;  %v4235_v49 = vld [vmem:[#allocation2 + $0x1cc] ss:$16 sps:$4 sm:$0xff]  }
 0x10a   :  { %v3479_v59 = vadd.f32 %v3478_v55, %v3477_v51  ;;  %v3480_v60 = vpop.f32.mrb[2].mxu1  ;;  %v3369_v61 = vpop.f32.mrb[3].mxu0 }
 0x10b   :  { %v901_v63 = vadd.f32 %v3367_v54, %v197_v41  ;;  %v3370_v0 = vadd.f32 %v3369_v61, %v3368_v56  ;;  %v3481_v1 = vpop.f32.mrb[3].mxu1  ;;  %v1277_v56 = vld [vmem:[#allocation2 + $0x1c0] sm:$0xff] }
 0x10c   :  { %v3482_v2 = vadd.f32 %v3481_v1, %v3480_v60  ;;  %1726 = vmatmul.mubr.bf16.gmra.mrb[108].mxu0 %v3105_v53  ;;  %v1280_v60 = vld [vmem:[#allocation2 + $0x1d8] sm:$0xff] }
 0x10d   :  { %v1062_v33 = vadd.f32 %v3479_v59, %v901_v63  ;;  %v904_v34 = vadd.f32 %v3370_v0, %v202_v50  ;;  %1887 = vmatmul.mubr.bf16.gmra.mrb[108].mxu1 %v3107_v57  ;;  %1733 = vmatprep.mubr.bf16.mxu0 %v4225_v58  ;;  %v1279_v57 = vld [vmem:[#allocation2 + $0x1d0] sm:$0xff]  ;;  %v227_v58 = vpop.permute.xlu0 %226  ;;  %v1278_v59 = vld [vmem:[#allocation2 + $0x1c8] sm:$0xff]  ;;  %v232_v63 = vpop.permute.xlu1 %231 }
 0x10e   :  { %1894 = vmatprep.mubr.bf16.mxu1 %v4227_v62  ;;  %v3119_v36 = vcombine.low %v1278_v59, %v1280_v60  ;;  %v4249_v59 = vld [vmem:[#allocation2 + $0x22c] ss:$16 sps:$4 sm:$0xff]  }
 0x10f   :  { %1189 = vst.msk [vmem:[%s5320_s5] sm:$0xff] %vm1188_vm0, %v1062_v33  ;;  %v1065_v5 = vadd.f32 %v3482_v2, %v904_v34  ;;  %v3371_v6 = vpop.f32.mrb[4].mxu0  ;;  %v3117_v2 = vcombine.low %v1277_v56, %v1279_v57 }
 0x110   :  { %v3483_v8 = vpop.f32.mrb[4].mxu1  ;;  %v3372_v9 = vpop.f32.mrb[5].mxu0 }
 0x111   :  { %1190 = vst.msk [vmem:[%s5320_s5 + $0x8] sm:$0xff] %vm1188_vm0, %v1065_v5  ;;  %v3373_v11 = vadd.f32 %v3372_v9, %v3371_v6  ;;  %v3484_v12 = vpop.f32.mrb[5].mxu1  ;;  %v3374_v13 = vpop.f32.mrb[6].mxu0 }
 0x112   :  { %v3485_v16 = vadd.f32 %v3484_v12, %v3483_v8  ;;  %v3486_v17 = vpop.f32.mrb[6].mxu1  ;;  %v3375_v18 = vpop.f32.mrb[7].mxu0 }
 0x113   :  { %v909_v20 = vadd.f32 %v3373_v11, %v207_v48  ;;  %v3376_v21 = vadd.f32 %v3375_v18, %v3374_v13  ;;  %v3487_v22 = vpop.f32.mrb[7].mxu1  ;;  %v1284_v18 = vld [vmem:[#allocation2 + $0x1f8] sm:$0xff] }
 0x114   :  { %v3488_v23 = vadd.f32 %v3487_v22, %v3486_v17  ;;  %1734 = vmatmul.mubr.bf16.gmra.mrb[112].mxu0 %v3109_v10  ;;  %v1282_v17 = vld [vmem:[#allocation2 + $0x1e8] sm:$0xff] }
 0x115   :  { %v1070_v24 = vadd.f32 %v3485_v16, %v909_v20  ;;  %v912_v25 = vadd.f32 %v3376_v21, %v212_v7  ;;  %1895 = vmatmul.mubr.bf16.gmra.mrb[112].mxu1 %v3111_v14  ;;  %1741 = vmatprep.mubr.bf16.mxu0 %v4229_v15  ;;  %v4239_v7 = vld [vmem:[#allocation2 + $0x1ec] ss:$16 sps:$4 sm:$0xff]   ;;  %v1281_v14 = vld [vmem:[#allocation2 + $0x1e0] sm:$0xff]  ;;  %v1283_v15 = vld [vmem:[#allocation2 + $0x1f0] sm:$0xff]  ;;  %v237_v16 = vpop.permute.xlu0 %236  ;;  %v242_v21 = vpop.permute.xlu1 %241 }
 0x116   :  { %1902 = vmatprep.mubr.bf16.mxu1 %v4231_v19 }
 0x117   :  { %1191 = vst.msk [vmem:[%s5320_s5 + $0x10] sm:$0xff] %vm1188_vm0, %v1070_v24  ;;  %v1073_v31 = vadd.f32 %v3488_v23, %v912_v25  ;;  %v3377_v32 = vpop.f32.mrb[8].mxu0  ;;  %v3121_v24 = vcombine.low %v1281_v14, %v1283_v15 }
 0x118   :  { %v3489_v38 = vpop.f32.mrb[8].mxu1  ;;  %v3378_v39 = vpop.f32.mrb[9].mxu0 }
 0x119   :  { %1192 = vst.msk [vmem:[%s5320_s5 + $0x18] sm:$0xff] %vm1188_vm0, %v1073_v31  ;;  %v3379_v41 = vadd.f32 %v3378_v39, %v3377_v32  ;;  %v3490_v42 = vpop.f32.mrb[9].mxu1  ;;  %v3380_v43 = vpop.f32.mrb[10].mxu0 }
 0x11a   :  { %v3491_v46 = vadd.f32 %v3490_v42, %v3489_v38  ;;  %v3492_v47 = vpop.f32.mrb[10].mxu1  ;;  %v3381_v48 = vpop.f32.mrb[11].mxu0 }
 0x11b   :  { %v917_v50 = vadd.f32 %v3379_v41, %v217_v28  ;;  %v3382_v51 = vadd.f32 %v3381_v48, %v3380_v43  ;;  %v3493_v52 = vpop.f32.mrb[11].mxu1  ;;  %v3123_v28 = vcombine.low %v1282_v17, %v1284_v18  ;;  %v4253_v17 = vld [vmem:[#allocation2 + $0x24c] ss:$16 sps:$4 sm:$0xff]  }
 0x11c   :  { %v3494_v53 = vadd.f32 %v3493_v52, %v3492_v47  ;;  %1742 = vmatmul.mubr.bf16.gmra.mrb[116].mxu0 %v3113_v40  ;;  %v252_v47 = vpop.permute.xlu1 %251 }
 0x11d   :  { %v1078_v54 = vadd.f32 %v3491_v46, %v917_v50  ;;  %v920_v55 = vadd.f32 %v3382_v51, %v222_v37  ;;  %1903 = vmatmul.mubr.bf16.gmra.mrb[116].mxu1 %v3115_v44  ;;  %1749 = vmatprep.mubr.bf16.mxu0 %v4233_v45  ;;  %v4246_v37 = vld [vmem:[#allocation2 + $0x20c] ss:$16 sps:$4 sm:$0xff]   ;;  %v247_v44 = vpop.permute.xlu0 %246  ;;  %v4241_v50 = vld [vmem:[#allocation2 + $0x200] ss:$16 sps:$4 sm:$0xff]  }
 0x11e   :  { %1910 = vmatprep.mubr.bf16.mxu1 %v4235_v49 }
 0x11f   :  { %1193 = vst.msk [vmem:[%s5320_s5 + $0x20] sm:$0xff] %vm1188_vm0, %v1078_v54  ;;  %v1081_v61 = vadd.f32 %v3494_v53, %v920_v55  ;;  %v3383_v62 = vpop.f32.mrb[12].mxu0  ;;  %v4244_v54 = vld [vmem:[#allocation2 + $0x208] ss:$16 sps:$4 sm:$0xff]   ;;  %v4247_v55 = vld [vmem:[#allocation2 + $0x224] ss:$16 sps:$4 sm:$0xff]  }
 0x120   :  { %v3495_v0 = vpop.f32.mrb[12].mxu1  ;;  %v3384_v1 = vpop.f32.mrb[13].mxu0 }
 0x121   :  { %1194 = vst.msk [vmem:[%s5320_s5 + $0x28] sm:$0xff] %vm1188_vm0, %v1081_v61  ;;  %v3385_v33 = vadd.f32 %v3384_v1, %v3383_v62  ;;  %v3496_v34 = vpop.f32.mrb[13].mxu1  ;;  %v3386_v35 = vpop.f32.mrb[14].mxu0 }
 0x122   :  { %v3497_v4 = vadd.f32 %v3496_v34, %v3495_v0  ;;  %v3498_v5 = vpop.f32.mrb[14].mxu1  ;;  %v3387_v6 = vpop.f32.mrb[15].mxu0 }
 0x123   :  { %v925_v8 = vadd.f32 %v3385_v33, %v227_v58  ;;  %v3388_v9 = vadd.f32 %v3387_v6, %v3386_v35  ;;  %v3499_v10 = vpop.f32.mrb[15].mxu1  ;;  %v2095_v33 = vld [vmem:[#allocation2 + $0x230] sm:$0xff]  ;;  %v257_v34 = vpop.permute.xlu0 %256  ;;  %v2094_v35 = vld [vmem:[#allocation2 + $0x228] sm:$0xff] }
 0x124   :  { %v3500_v11 = vadd.f32 %v3499_v10, %v3498_v5  ;;  %1750 = vmatmul.mubr.bf16.gmra.mrb[120].mxu0 %v3117_v2  ;;  %v2093_v2 = vld [vmem:[#allocation2 + $0x220] sm:$0xff]  ;;  %v262_v5 = vpop.permute.xlu1 %261 }
 0x125   :  { %v1086_v12 = vadd.f32 %v3497_v4, %v925_v8  ;;  %v928_v13 = vadd.f32 %v3388_v9, %v232_v63  ;;  %1911 = vmatmul.mubr.bf16.gmra.mrb[120].mxu1 %v3119_v36  ;;  %1757 = vmatprep.mubr.bf16.mxu0 %v4237_v3  ;;  %v2096_v36 = vld [vmem:[#allocation2 + $0x238] sm:$0xff]  ;;  %v3161_v8 = vcombine.low %v2093_v2, %v2095_v33 }
 0x126   :  { %1918 = vmatprep.mubr.bf16.mxu1 %v4239_v7 }
 0x127   :  { %1195 = vst.msk [vmem:[%s5320_s5 + $0x30] sm:$0xff] %vm1188_vm0, %v1086_v12  ;;  %v1089_v19 = vadd.f32 %v3500_v11, %v928_v13  ;;  %v3389_v20 = vpop.f32.mrb[16].mxu0  ;;  %v3163_v12 = vcombine.low %v2094_v35, %v2096_v36  ;;  %v4251_v13 = vld [vmem:[#allocation2 + $0x244] ss:$16 sps:$4 sm:$0xff]  }
 0x128   :  { %v3501_v22 = vpop.f32.mrb[16].mxu1  ;;  %v3390_v23 = vpop.f32.mrb[17].mxu0  ;;  %v4259_v35 = vld [vmem:[#allocation2 + $0x284] ss:$16 sps:$4 sm:$0xff]  }
 0x129   :  { %1196 = vst.msk [vmem:[%s5320_s5 + $0x38] sm:$0xff] %vm1188_vm0, %v1089_v19  ;;  %v3391_v25 = vadd.f32 %v3390_v23, %v3389_v20  ;;  %v3502_v26 = vpop.f32.mrb[17].mxu1  ;;  %v3392_v27 = vpop.f32.mrb[18].mxu0 }
 0x12a   :  { %v3503_v30 = vadd.f32 %v3502_v26, %v3501_v22  ;;  %v3504_v31 = vpop.f32.mrb[18].mxu1  ;;  %v3393_v32 = vpop.f32.mrb[19].mxu0 }
 0x12b   :  { %v933_v38 = vadd.f32 %v3391_v25, %v237_v16  ;;  %v3394_v39 = vadd.f32 %v3393_v32, %v3392_v27  ;;  %v3505_v40 = vpop.f32.mrb[19].mxu1  ;;  %v2099_v25 = vld [vmem:[#allocation2 + $0x250] sm:$0xff]  ;;  %v267_v26 = vpop.permute.xlu0 %266  ;;  %v2098_v27 = vld [vmem:[#allocation2 + $0x248] sm:$0xff] }
 0x12c   :  { %v3506_v41 = vadd.f32 %v3505_v40, %v3504_v31  ;;  %1758 = vmatmul.mubr.bf16.gmra.mrb[124].mxu0 %v3121_v24  ;;  %v2097_v24 = vld [vmem:[#allocation2 + $0x240] sm:$0xff]  ;;  %v272_v31 = vpop.permute.xlu1 %271 }
 0x12d   :  { %v1094_v42 = vadd.f32 %v3503_v30, %v933_v38  ;;  %v936_v43 = vadd.f32 %v3394_v39, %v242_v21  ;;  %1919 = vmatmul.mubr.bf16.gmra.mrb[124].mxu1 %v3123_v28  ;;  %2505 = vmatprep.mubr.bf16.mxu0 %v4243_v29  ;;  %v2100_v28 = vld [vmem:[#allocation2 + $0x258] sm:$0xff]  ;;  %v3165_v38 = vcombine.low %v2097_v24, %v2099_v25 }
 0x12e   :  { %2666 = vmatprep.mubr.bf16.mxu1 %v4246_v37 }
 0x12f   :  { %1197 = vst.msk [vmem:[%s5320_s5 + $0x40] sm:$0xff] %vm1188_vm0, %v1094_v42  ;;  %v1097_v45 = vadd.f32 %v3506_v41, %v936_v43  ;;  %v3395_v46 = vpop.f32.mrb[20].mxu0  ;;  %v3167_v42 = vcombine.low %v2098_v27, %v2100_v28  ;;  %v4255_v43 = vld [vmem:[#allocation2 + $0x264] ss:$16 sps:$4 sm:$0xff]  }
 0x130   :  { %v3507_v48 = vpop.f32.mrb[20].mxu1  ;;  %v3396_v49 = vpop.f32.mrb[21].mxu0  ;;  %v4263_v27 = vld [vmem:[#allocation2 + $0x2a4] ss:$16 sps:$4 sm:$0xff]  }
 0x131   :  { %1198 = vst.msk [vmem:[%s5320_s5 + $0x48] sm:$0xff] %vm1188_vm0, %v1097_v45  ;;  %v3397_v51 = vadd.f32 %v3396_v49, %v3395_v46  ;;  %v3508_v52 = vpop.f32.mrb[21].mxu1  ;;  %v3398_v53 = vpop.f32.mrb[22].mxu0 }
 0x132   :  { %v3509_v56 = vadd.f32 %v3508_v52, %v3507_v48  ;;  %v3510_v57 = vpop.f32.mrb[22].mxu1  ;;  %v3399_v58 = vpop.f32.mrb[23].mxu0 }
 0x133   :  { %v941_v60 = vadd.f32 %v3397_v51, %v247_v44  ;;  %v3400_v61 = vadd.f32 %v3399_v58, %v3398_v53  ;;  %v3511_v62 = vpop.f32.mrb[23].mxu1  ;;  %v2104_v58 = vld [vmem:[#allocation2 + $0x278] sm:$0xff] }
 0x134   :  { %v3512_v63 = vadd.f32 %v3511_v62, %v3510_v57  ;;  %2506 = vmatmul.mubr.bf16.vlgmr.msra.gmra.mrb[128].mxu0 %v4241_v50  ;;  %v2102_v57 = vld [vmem:[#allocation2 + $0x268] sm:$0xff] }
 0x135   :  { %v1102_v0 = vadd.f32 %v3509_v56, %v941_v60  ;;  %v944_v1 = vadd.f32 %v3400_v61, %v252_v47  ;;  %2667 = vmatmul.mubr.bf16.vlgmr.msra.gmra.mrb[128].mxu1 %v4244_v54  ;;  %2513 = vmatprep.mubr.bf16.mxu0 %v4247_v55  ;;  %v4257_v47 = vld [vmem:[#allocation2 + $0x26c] ss:$16 sps:$4 sm:$0xff]   ;;  %v2101_v54 = vld [vmem:[#allocation2 + $0x260] sm:$0xff]  ;;  %v2103_v55 = vld [vmem:[#allocation2 + $0x270] sm:$0xff]  ;;  %v277_v56 = vpop.permute.xlu0 %276  ;;  %v282_v61 = vpop.permute.xlu1 %281 }
 0x136   :  { %2674 = vmatprep.mubr.bf16.mxu1 %v4249_v59 }
 0x137   :  { %1199 = vst.msk [vmem:[%s5320_s5 + $0x50] sm:$0xff] %vm1188_vm0, %v1102_v0  ;;  %v1105_v3 = vadd.f32 %v3512_v63, %v944_v1  ;;  %v3401_v4 = vpop.f32.mrb[24].mxu0  ;;  %v3169_v0 = vcombine.low %v2101_v54, %v2103_v55 }
 0x138   :  { %v3513_v6 = vpop.f32.mrb[24].mxu1  ;;  %v3402_v7 = vpop.f32.mrb[25].mxu0 }
 0x139   :  { %1200 = vst.msk [vmem:[%s5320_s5 + $0x58] sm:$0xff] %vm1188_vm0, %v1105_v3  ;;  %v3403_v9 = vadd.f32 %v3402_v7, %v3401_v4  ;;  %v3514_v10 = vpop.f32.mrb[25].mxu1  ;;  %v3404_v11 = vpop.f32.mrb[26].mxu0 }
 0x13a   :  { %v3515_v14 = vadd.f32 %v3514_v10, %v3513_v6  ;;  %v3516_v15 = vpop.f32.mrb[26].mxu1  ;;  %v3405_v16 = vpop.f32.mrb[27].mxu0 }
 0x13b   :  { %v949_v18 = vadd.f32 %v3403_v9, %v257_v34  ;;  %v3406_v19 = vadd.f32 %v3405_v16, %v3404_v11  ;;  %v3517_v20 = vpop.f32.mrb[27].mxu1  ;;  %v3171_v34 = vcombine.low %v2102_v57, %v2104_v58  ;;  %v2108_v16 = vld [vmem:[#allocation2 + $0x298] sm:$0xff]  ;;  %v4267_v57 = vld [vmem:[#allocation2 + $0x2c4] ss:$16 sps:$4 sm:$0xff]  }
 0x13c   :  { %v3518_v21 = vadd.f32 %v3517_v20, %v3516_v15  ;;  %2514 = vmatmul.mubr.bf16.gmra.mrb[132].mxu0 %v3161_v8  ;;  %v2106_v15 = vld [vmem:[#allocation2 + $0x288] sm:$0xff] }
 0x13d   :  { %v1110_v22 = vadd.f32 %v3515_v14, %v949_v18  ;;  %v952_v23 = vadd.f32 %v3406_v19, %v262_v5  ;;  %2675 = vmatmul.mubr.bf16.gmra.mrb[132].mxu1 %v3163_v12  ;;  %2521 = vmatprep.mubr.bf16.mxu0 %v4251_v13  ;;  %v4261_v5 = vld [vmem:[#allocation2 + $0x28c] ss:$16 sps:$4 sm:$0xff]   ;;  %v2105_v12 = vld [vmem:[#allocation2 + $0x280] sm:$0xff]  ;;  %v2107_v13 = vld [vmem:[#allocation2 + $0x290] sm:$0xff]  ;;  %v287_v14 = vpop.permute.xlu0 %286  ;;  %v292_v19 = vpop.permute.xlu1 %291 }
 0x13e   :  { %2682 = vmatprep.mubr.bf16.mxu1 %v4253_v17 }
 0x13f   :  { %1201 = vst.msk [vmem:[%s5320_s5 + $0x60] sm:$0xff] %vm1188_vm0, %v1110_v22  ;;  %v1113_v29 = vadd.f32 %v3518_v21, %v952_v23  ;;  %v3407_v30 = vpop.f32.mrb[28].mxu0  ;;  %v3173_v22 = vcombine.low %v2105_v12, %v2107_v13 }
 0x140   :  { %v3519_v32 = vpop.f32.mrb[28].mxu1  ;;  %v3408_v37 = vpop.f32.mrb[29].mxu0 }
 0x141   :  { %1202 = vst.msk [vmem:[%s5320_s5 + $0x68] sm:$0xff] %vm1188_vm0, %v1113_v29  ;;  %v3409_v39 = vadd.f32 %v3408_v37, %v3407_v30  ;;  %v3520_v40 = vpop.f32.mrb[29].mxu1  ;;  %v3410_v41 = vpop.f32.mrb[30].mxu0 }
 0x142   :  { %v3521_v44 = vadd.f32 %v3520_v40, %v3519_v32  ;;  %v3522_v45 = vpop.f32.mrb[30].mxu1  ;;  %v3411_v46 = vpop.f32.mrb[31].mxu0 }
 0x143   :  { %v957_v48 = vadd.f32 %v3409_v39, %v267_v26  ;;  %v3412_v49 = vadd.f32 %v3411_v46, %v3410_v41  ;;  %v3523_v50 = vpop.f32.mrb[31].mxu1  ;;  %v3175_v26 = vcombine.low %v2106_v15, %v2108_v16  ;;  %v2112_v46 = vld [vmem:[#allocation2 + $0x2b8] sm:$0xff]  ;;  %v4271_v15 = vld [vmem:[#allocation2 + $0x2e4] ss:$16 sps:$4 sm:$0xff]  }
 0x144   :  { %v3524_v51 = vadd.f32 %v3523_v50, %v3522_v45  ;;  %2522 = vmatmul.mubr.bf16.gmra.mrb[136].mxu0 %v3165_v38  ;;  %v2110_v45 = vld [vmem:[#allocation2 + $0x2a8] sm:$0xff] }
 0x145   :  { %v1118_v52 = vadd.f32 %v3521_v44, %v957_v48  ;;  %v960_v53 = vadd.f32 %v3412_v49, %v272_v31  ;;  %2683 = vmatmul.mubr.bf16.gmra.mrb[136].mxu1 %v3167_v42  ;;  %2529 = vmatprep.mubr.bf16.mxu0 %v4255_v43  ;;  %v4265_v31 = vld [vmem:[#allocation2 + $0x2ac] ss:$16 sps:$4 sm:$0xff]   ;;  %v2109_v42 = vld [vmem:[#allocation2 + $0x2a0] sm:$0xff]  ;;  %v2111_v43 = vld [vmem:[#allocation2 + $0x2b0] sm:$0xff]  ;;  %v297_v44 = vpop.permute.xlu0 %296  ;;  %v302_v49 = vpop.permute.xlu1 %301 }
 0x146   :  { %2690 = vmatprep.mubr.bf16.mxu1 %v4257_v47 }
 0x147   :  { %1203 = vst.msk [vmem:[%s5320_s5 + $0x70] sm:$0xff] %vm1188_vm0, %v1118_v52  ;;  %v1121_v59 = vadd.f32 %v3524_v51, %v960_v53  ;;  %v3413_v60 = vpop.f32.mrb[32].mxu0  ;;  %v3177_v52 = vcombine.low %v2109_v42, %v2111_v43 }
 0x148   :  { %v3525_v62 = vpop.f32.mrb[32].mxu1  ;;  %v3414_v63 = vpop.f32.mrb[33].mxu0 }
 0x149   :  { %1204 = vst.msk [vmem:[%s5320_s5 + $0x78] sm:$0xff] %vm1188_vm0, %v1121_v59  ;;  %v3415_v1 = vadd.f32 %v3414_v63, %v3413_v60  ;;  %v3526_v2 = vpop.f32.mrb[33].mxu1  ;;  %v3416_v33 = vpop.f32.mrb[34].mxu0 }
 0x14a   :  { %v3527_v36 = vadd.f32 %v3526_v2, %v3525_v62  ;;  %v3528_v3 = vpop.f32.mrb[34].mxu1  ;;  %v3417_v4 = vpop.f32.mrb[35].mxu0 }
 0x14b   :  { %v965_v6 = vadd.f32 %v3415_v1, %v277_v56  ;;  %v3418_v7 = vadd.f32 %v3417_v4, %v3416_v33  ;;  %v3529_v8 = vpop.f32.mrb[35].mxu1  ;;  %v3179_v56 = vcombine.low %v2110_v45, %v2112_v46  ;;  %v2116_v4 = vld [vmem:[#allocation2 + $0x2d8] sm:$0xff]  ;;  %v4275_v45 = vld [vmem:[#allocation2 + $0x304] ss:$16 sps:$4 sm:$0xff]  }
 0x14c   :  { %v3530_v9 = vadd.f32 %v3529_v8, %v3528_v3  ;;  %2530 = vmatmul.mubr.bf16.gmra.mrb[140].mxu0 %v3169_v0  ;;  %v2114_v3 = vld [vmem:[#allocation2 + $0x2c8] sm:$0xff] }
 0x14d   :  { %v1126_v10 = vadd.f32 %v3527_v36, %v965_v6  ;;  %v968_v11 = vadd.f32 %v3418_v7, %v282_v61  ;;  %2691 = vmatmul.mubr.bf16.gmra.mrb[140].mxu1 %v3171_v34  ;;  %2537 = vmatprep.mubr.bf16.mxu0 %v4259_v35  ;;  %v4269_v61 = vld [vmem:[#allocation2 + $0x2cc] ss:$16 sps:$4 sm:$0xff]   ;;  %v2113_v34 = vld [vmem:[#allocation2 + $0x2c0] sm:$0xff]  ;;  %v2115_v35 = vld [vmem:[#allocation2 + $0x2d0] sm:$0xff]  ;;  %v307_v36 = vpop.permute.xlu0 %306  ;;  %v312_v7 = vpop.permute.xlu1 %311 }
 0x14e   :  { %2698 = vmatprep.mubr.bf16.mxu1 %v4261_v5 }
 0x14f   :  { %1205 = vst.msk [vmem:[%s5320_s5 + $0x80] sm:$0xff] %vm1188_vm0, %v1126_v10  ;;  %v1129_v17 = vadd.f32 %v3530_v9, %v968_v11  ;;  %v3419_v18 = vpop.f32.mrb[36].mxu0  ;;  %v3181_v10 = vcombine.low %v2113_v34, %v2115_v35 }
 0x150   :  { %v3531_v20 = vpop.f32.mrb[36].mxu1  ;;  %v3420_v21 = vpop.f32.mrb[37].mxu0 }
 0x151   :  { %1206 = vst.msk [vmem:[%s5320_s5 + $0x88] sm:$0xff] %vm1188_vm0, %v1129_v17  ;;  %v3421_v23 = vadd.f32 %v3420_v21, %v3419_v18  ;;  %v3532_v24 = vpop.f32.mrb[37].mxu1  ;;  %v3422_v25 = vpop.f32.mrb[38].mxu0 }
 0x152   :  { %v3533_v28 = vadd.f32 %v3532_v24, %v3531_v20  ;;  %v3534_v29 = vpop.f32.mrb[38].mxu1  ;;  %v3423_v30 = vpop.f32.mrb[39].mxu0 }
 0x153   :  { %v973_v32 = vadd.f32 %v3421_v23, %v287_v14  ;;  %v3424_v37 = vadd.f32 %v3423_v30, %v3422_v25  ;;  %v3535_v38 = vpop.f32.mrb[39].mxu1  ;;  %v3183_v14 = vcombine.low %v2114_v3, %v2116_v4  ;;  %v2120_v30 = vld [vmem:[#allocation2 + $0x2f8] sm:$0xff]  ;;  %v4279_v3 = vld [vmem:[#allocation2 + $0x324] ss:$16 sps:$4 sm:$0xff]  }
 0x154   :  { %v3536_v39 = vadd.f32 %v3535_v38, %v3534_v29  ;;  %2538 = vmatmul.mubr.bf16.gmra.mrb[144].mxu0 %v3173_v22  ;;  %v2118_v29 = vld [vmem:[#allocation2 + $0x2e8] sm:$0xff] }
 0x155   :  { %v1134_v40 = vadd.f32 %v3533_v28, %v973_v32  ;;  %v976_v41 = vadd.f32 %v3424_v37, %v292_v19  ;;  %2699 = vmatmul.mubr.bf16.gmra.mrb[144].mxu1 %v3175_v26  ;;  %2545 = vmatprep.mubr.bf16.mxu0 %v4263_v27  ;;  %v4273_v19 = vld [vmem:[#allocation2 + $0x2ec] ss:$16 sps:$4 sm:$0xff]   ;;  %v2117_v26 = vld [vmem:[#allocation2 + $0x2e0] sm:$0xff]  ;;  %v2119_v27 = vld [vmem:[#allocation2 + $0x2f0] sm:$0xff]  ;;  %v317_v28 = vpop.permute.xlu0 %316  ;;  %v322_v37 = vpop.permute.xlu1 %321 }
 0x156   :  { %2706 = vmatprep.mubr.bf16.mxu1 %v4265_v31 }
 0x157   :  { %1207 = vst.msk [vmem:[%s5320_s5 + $0x90] sm:$0xff] %vm1188_vm0, %v1134_v40  ;;  %v1137_v47 = vadd.f32 %v3536_v39, %v976_v41  ;;  %v3425_v48 = vpop.f32.mrb[40].mxu0  ;;  %v3185_v40 = vcombine.low %v2117_v26, %v2119_v27 }
 0x158   :  { %v3537_v50 = vpop.f32.mrb[40].mxu1  ;;  %v3426_v51 = vpop.f32.mrb[41].mxu0 }
 0x159   :  { %1208 = vst.msk [vmem:[%s5320_s5 + $0x98] sm:$0xff] %vm1188_vm0, %v1137_v47  ;;  %v3427_v53 = vadd.f32 %v3426_v51, %v3425_v48  ;;  %v3538_v54 = vpop.f32.mrb[41].mxu1  ;;  %v3428_v55 = vpop.f32.mrb[42].mxu0 }
 0x15a   :  { %v3539_v58 = vadd.f32 %v3538_v54, %v3537_v50  ;;  %v3540_v59 = vpop.f32.mrb[42].mxu1  ;;  %v3429_v60 = vpop.f32.mrb[43].mxu0 }
 0x15b   :  { %v981_v62 = vadd.f32 %v3427_v53, %v297_v44  ;;  %v3430_v63 = vadd.f32 %v3429_v60, %v3428_v55  ;;  %v3541_v0 = vpop.f32.mrb[43].mxu1  ;;  %v3187_v44 = vcombine.low %v2118_v29, %v2120_v30  ;;  %v2124_v60 = vld [vmem:[#allocation2 + $0x318] sm:$0xff]  ;;  %v4283_v29 = vld [vmem:[#allocation2 + $0x344] ss:$16 sps:$4 sm:$0xff]  }
 0x15c   :  { %v3542_v1 = vadd.f32 %v3541_v0, %v3540_v59  ;;  %2546 = vmatmul.mubr.bf16.gmra.mrb[148].mxu0 %v3177_v52  ;;  %v2122_v59 = vld [vmem:[#allocation2 + $0x308] sm:$0xff] }
 0x15d   :  { %v1142_v2 = vadd.f32 %v3539_v58, %v981_v62  ;;  %v984_v33 = vadd.f32 %v3430_v63, %v302_v49  ;;  %2707 = vmatmul.mubr.bf16.gmra.mrb[148].mxu1 %v3179_v56  ;;  %2553 = vmatprep.mubr.bf16.mxu0 %v4267_v57  ;;  %v4277_v49 = vld [vmem:[#allocation2 + $0x30c] ss:$16 sps:$4 sm:$0xff]   ;;  %v2121_v56 = vld [vmem:[#allocation2 + $0x300] sm:$0xff]  ;;  %v2123_v57 = vld [vmem:[#allocation2 + $0x310] sm:$0xff]  ;;  %v327_v58 = vpop.permute.xlu0 %326  ;;  %v332_v63 = vpop.permute.xlu1 %331 }
 0x15e   :  { %2714 = vmatprep.mubr.bf16.mxu1 %v4269_v61 }
 0x15f   :  { %1209 = vst.msk [vmem:[%s5320_s5 + $0xa0] sm:$0xff] %vm1188_vm0, %v1142_v2  ;;  %v1145_v5 = vadd.f32 %v3542_v1, %v984_v33  ;;  %v3431_v6 = vpop.f32.mrb[44].mxu0  ;;  %v3189_v2 = vcombine.low %v2121_v56, %v2123_v57 }
 0x160   :  { %v3543_v8 = vpop.f32.mrb[44].mxu1  ;;  %v3432_v9 = vpop.f32.mrb[45].mxu0 }
 0x161   :  { %1210 = vst.msk [vmem:[%s5320_s5 + $0xa8] sm:$0xff] %vm1188_vm0, %v1145_v5  ;;  %v3433_v11 = vadd.f32 %v3432_v9, %v3431_v6  ;;  %v3544_v12 = vpop.f32.mrb[45].mxu1  ;;  %v3434_v13 = vpop.f32.mrb[46].mxu0 }
 0x162   :  { %v3545_v16 = vadd.f32 %v3544_v12, %v3543_v8  ;;  %v3546_v17 = vpop.f32.mrb[46].mxu1  ;;  %v3435_v18 = vpop.f32.mrb[47].mxu0 }
 0x163   :  { %v989_v20 = vadd.f32 %v3433_v11, %v307_v36  ;;  %v3436_v21 = vadd.f32 %v3435_v18, %v3434_v13  ;;  %v3547_v22 = vpop.f32.mrb[47].mxu1  ;;  %v3191_v36 = vcombine.low %v2122_v59, %v2124_v60  ;;  %v2128_v18 = vld [vmem:[#allocation2 + $0x338] sm:$0xff]  ;;  %v4287_v59 = vld [vmem:[#allocation2 + $0x364] ss:$16 sps:$4 sm:$0xff]  }
 0x164   :  { %v3548_v23 = vadd.f32 %v3547_v22, %v3546_v17  ;;  %2554 = vmatmul.mubr.bf16.gmra.mrb[152].mxu0 %v3181_v10  ;;  %v2126_v17 = vld [vmem:[#allocation2 + $0x328] sm:$0xff] }
 0x165   :  { %v1150_v24 = vadd.f32 %v3545_v16, %v989_v20  ;;  %v992_v25 = vadd.f32 %v3436_v21, %v312_v7  ;;  %2715 = vmatmul.mubr.bf16.gmra.mrb[152].mxu1 %v3183_v14  ;;  %2561 = vmatprep.mubr.bf16.mxu0 %v4271_v15  ;;  %v4281_v7 = vld [vmem:[#allocation2 + $0x32c] ss:$16 sps:$4 sm:$0xff]   ;;  %v2125_v14 = vld [vmem:[#allocation2 + $0x320] sm:$0xff]  ;;  %v2127_v15 = vld [vmem:[#allocation2 + $0x330] sm:$0xff]  ;;  %v337_v16 = vpop.permute.xlu0 %336  ;;  %v342_v21 = vpop.permute.xlu1 %341 }
 0x166   :  { %2722 = vmatprep.mubr.bf16.mxu1 %v4273_v19 }
 0x167   :  { %1211 = vst.msk [vmem:[%s5320_s5 + $0xb0] sm:$0xff] %vm1188_vm0, %v1150_v24  ;;  %v1153_v31 = vadd.f32 %v3548_v23, %v992_v25  ;;  %v3437_v32 = vpop.f32.mrb[48].mxu0  ;;  %v3193_v24 = vcombine.low %v2125_v14, %v2127_v15  ;;  %v4295_v15 = vld [vmem:[#allocation2 + $0x38c] ss:$16 sps:$4 sm:$0xff]  }
 0x168   :  { %v3549_v38 = vpop.f32.mrb[48].mxu1  ;;  %v3438_v39 = vpop.f32.mrb[49].mxu0 }
 0x169   :  { %1212 = vst.msk [vmem:[%s5320_s5 + $0xb8] sm:$0xff] %vm1188_vm0, %v1153_v31  ;;  %v3439_v41 = vadd.f32 %v3438_v39, %v3437_v32  ;;  %v3550_v42 = vpop.f32.mrb[49].mxu1  ;;  %v3440_v43 = vpop.f32.mrb[50].mxu0 }
 0x16a   :  { %v3551_v46 = vadd.f32 %v3550_v42, %v3549_v38  ;;  %v3552_v47 = vpop.f32.mrb[50].mxu1  ;;  %v3441_v48 = vpop.f32.mrb[51].mxu0 }
 0x16b   :  { %v997_v50 = vadd.f32 %v3439_v41, %v317_v28  ;;  %v3442_v51 = vadd.f32 %v3441_v48, %v3440_v43  ;;  %v3553_v52 = vpop.f32.mrb[51].mxu1  ;;  %v3195_v28 = vcombine.low %v2126_v17, %v2128_v18  ;;  %v2132_v48 = vld [vmem:[#allocation2 + $0x358] sm:$0xff] }
 0x16c   :  { %v3554_v53 = vadd.f32 %v3553_v52, %v3552_v47  ;;  %2562 = vmatmul.mubr.bf16.gmra.mrb[156].mxu0 %v3185_v40  ;;  %v2130_v47 = vld [vmem:[#allocation2 + $0x348] sm:$0xff] }
 0x16d   :  { %v1158_v54 = vadd.f32 %v3551_v46, %v997_v50  ;;  %v1000_v55 = vadd.f32 %v3442_v51, %v322_v37  ;;  %2723 = vmatmul.mubr.bf16.gmra.mrb[156].mxu1 %v3187_v44  ;;  %2569 = vmatprep.mubr.bf16.mxu0 %v4275_v45  ;;  %v4285_v37 = vld [vmem:[#allocation2 + $0x34c] ss:$16 sps:$4 sm:$0xff]   ;;  %v2129_v44 = vld [vmem:[#allocation2 + $0x340] sm:$0xff]  ;;  %v2131_v45 = vld [vmem:[#allocation2 + $0x350] sm:$0xff]  ;;  %v347_v46 = vpop.permute.xlu0 %346  ;;  %v352_v51 = vpop.permute.xlu1 %351 }
 0x16e   :  { %2730 = vmatprep.mubr.bf16.mxu1 %v4277_v49 }
 0x16f   :  { %1213 = vst.msk [vmem:[%s5320_s5 + $0xc0] sm:$0xff] %vm1188_vm0, %v1158_v54  ;;  %v1161_v61 = vadd.f32 %v3554_v53, %v1000_v55  ;;  %v3443_v62 = vpop.f32.mrb[52].mxu0  ;;  %v3197_v54 = vcombine.low %v2129_v44, %v2131_v45 }
 0x170   :  { %v3555_v0 = vpop.f32.mrb[52].mxu1  ;;  %v3444_v1 = vpop.f32.mrb[53].mxu0 }
 0x171   :  { %1214 = vst.msk [vmem:[%s5320_s5 + $0xc8] sm:$0xff] %vm1188_vm0, %v1161_v61  ;;  %v3445_v33 = vadd.f32 %v3444_v1, %v3443_v62  ;;  %v3556_v34 = vpop.f32.mrb[53].mxu1  ;;  %v3446_v35 = vpop.f32.mrb[54].mxu0 }
 0x172   :  { %v3557_v4 = vadd.f32 %v3556_v34, %v3555_v0  ;;  %v3558_v5 = vpop.f32.mrb[54].mxu1  ;;  %v3447_v6 = vpop.f32.mrb[55].mxu0 }
 0x173   :  { %v1005_v8 = vadd.f32 %v3445_v33, %v327_v58  ;;  %v3448_v9 = vadd.f32 %v3447_v6, %v3446_v35  ;;  %v3559_v10 = vpop.f32.mrb[55].mxu1  ;;  %v3199_v58 = vcombine.low %v2130_v47, %v2132_v48  ;;  %v4291_v6 = vld [vmem:[#allocation2 + $0x360] ss:$16 sps:$4 sm:$0xff]  }
 0x174   :  { %v3560_v11 = vadd.f32 %v3559_v10, %v3558_v5  ;;  %2570 = vmatmul.mubr.bf16.gmra.mrb[160].mxu0 %v3189_v2  ;;  %v4292_v10 = vld [vmem:[#allocation2 + $0x368] ss:$16 sps:$4 sm:$0xff]  }
 0x175   :  { %v1166_v12 = vadd.f32 %v3557_v4, %v1005_v8  ;;  %v1008_v13 = vadd.f32 %v3448_v9, %v332_v63  ;;  %2731 = vmatmul.mubr.bf16.gmra.mrb[160].mxu1 %v3191_v36  ;;  %2577 = vmatprep.mubr.bf16.mxu0 %v4279_v3  ;;  %v4289_v63 = vld [vmem:[#allocation2 + $0x36c] ss:$16 sps:$4 sm:$0xff]  }
 0x176   :  { %2738 = vmatprep.mubr.bf16.mxu1 %v4281_v7 }
 0x177   :  { %1215 = vst.msk [vmem:[%s5320_s5 + $0xd0] sm:$0xff] %vm1188_vm0, %v1166_v12  ;;  %v1169_v19 = vadd.f32 %v3560_v11, %v1008_v13  ;;  %v3449_v20 = vpop.f32.mrb[56].mxu0  ;;  %v4293_v11 = vld [vmem:[#allocation2 + $0x384] ss:$16 sps:$4 sm:$0xff]  }
 0x178   :  { %v3561_v22 = vpop.f32.mrb[56].mxu1  ;;  %v3450_v23 = vpop.f32.mrb[57].mxu0 }
 0x179   :  { %1216 = vst.msk [vmem:[%s5320_s5 + $0xd8] sm:$0xff] %vm1188_vm0, %v1169_v19  ;;  %v3451_v25 = vadd.f32 %v3450_v23, %v3449_v20  ;;  %v3562_v26 = vpop.f32.mrb[57].mxu1  ;;  %v3452_v27 = vpop.f32.mrb[58].mxu0 }
 0x17a   :  { %v3563_v30 = vadd.f32 %v3562_v26, %v3561_v22  ;;  %v3564_v31 = vpop.f32.mrb[58].mxu1  ;;  %v3453_v32 = vpop.f32.mrb[59].mxu0  ;;  %v4297_v26 = vld [vmem:[#allocation2 + $0x380] ss:$16 sps:$4 sm:$0xff]  }
 0x17b   :  { %v1013_v38 = vadd.f32 %v3451_v25, %v337_v16  ;;  %v3454_v39 = vadd.f32 %v3453_v32, %v3452_v27  ;;  %v3565_v40 = vpop.f32.mrb[59].mxu1 }
 0x17c   :  { %v3566_v41 = vadd.f32 %v3565_v40, %v3564_v31  ;;  %2578 = vmatmul.mubr.bf16.gmra.mrb[164].mxu0 %v3193_v24  ;;  %v4299_v31 = vld [vmem:[#allocation2 + $0x3a4] ss:$16 sps:$4 sm:$0xff]  }
 0x17d   :  { %v1174_v42 = vadd.f32 %v3563_v30, %v1013_v38  ;;  %v1016_v43 = vadd.f32 %v3454_v39, %v342_v21  ;;  %2739 = vmatmul.mubr.bf16.gmra.mrb[164].mxu1 %v3195_v28  ;;  %2585 = vmatprep.mubr.bf16.mxu0 %v4283_v29  ;;  %v4298_v30 = vld [vmem:[#allocation2 + $0x388] ss:$16 sps:$4 sm:$0xff]   ;;  %v4301_v39 = vld [vmem:[#allocation2 + $0x3ac] ss:$16 sps:$4 sm:$0xff]  }
 0x17e   :  { %2746 = vmatprep.mubr.bf16.mxu1 %v4285_v37 }
 0x17f   :  { %1217 = vst.msk [vmem:[%s5320_s5 + $0xe0] sm:$0xff] %vm1188_vm0, %v1174_v42  ;;  %v1177_v49 = vadd.f32 %v3566_v41, %v1016_v43  ;;  %v3455_v50 = vpop.f32.mrb[60].mxu0 }
 0x180   :  { %v3567_v52 = vpop.f32.mrb[60].mxu1  ;;  %v3456_v53 = vpop.f32.mrb[61].mxu0 }
 0x181   :  { %1218 = vst.msk [vmem:[%s5320_s5 + $0xe8] sm:$0xff] %vm1188_vm0, %v1177_v49  ;;  %v3457_v55 = vadd.f32 %v3456_v53, %v3455_v50  ;;  %v3568_v56 = vpop.f32.mrb[61].mxu1  ;;  %v3458_v57 = vpop.f32.mrb[62].mxu0  ;;  %v4303_v50 = vld [vmem:[#allocation2 + $0x3a0] ss:$16 sps:$4 sm:$0xff]  }
 0x182   :  { %v3569_v60 = vadd.f32 %v3568_v56, %v3567_v52  ;;  %v3570_v61 = vpop.f32.mrb[62].mxu1  ;;  %v3459_v62 = vpop.f32.mrb[63].mxu0 }
 0x183   :  { %v1021_v0 = vadd.f32 %v3457_v55, %v347_v46  ;;  %v3460_v1 = vadd.f32 %v3459_v62, %v3458_v57  ;;  %v3571_v2 = vpop.f32.mrb[63].mxu1  ;;  %v4305_v55 = vld [vmem:[#allocation2 + $0x3c4] ss:$16 sps:$4 sm:$0xff]  }
 0x184   :  { %v3572_v33 = vadd.f32 %v3571_v2, %v3570_v61  ;;  %2586 = vmatmul.mubr.bf16.gmra.mrb[168].mxu0 %v3197_v54  ;;  %v4304_v54 = vld [vmem:[#allocation2 + $0x3a8] ss:$16 sps:$4 sm:$0xff]  }
 0x185   :  { %v1182_v34 = vadd.f32 %v3569_v60, %v1021_v0  ;;  %v1024_v35 = vadd.f32 %v3460_v1, %v352_v51  ;;  %2747 = vmatmul.mubr.bf16.gmra.mrb[168].mxu1 %v3199_v58  ;;  %2593 = vmatprep.mubr.bf16.mxu0 %v4287_v59  ;;  %v4307_v59 = vld [vmem:[#allocation2 + $0x3cc] ss:$16 sps:$4 sm:$0xff]  }
 0x186   :  { %2754 = vmatprep.mubr.bf16.mxu1 %v4289_v63 }
 0x187   :  { %1219 = vst.msk [vmem:[%s5320_s5 + $0xf0] sm:$0xff] %vm1188_vm0, %v1182_v34  ;;  %v1185_v36 = vadd.f32 %v3572_v33, %v1024_v35  ;;  %v3589_v3 = vpop.f32.mrb[64].mxu0 }
 0x188   :  { %v3701_v4 = vpop.f32.mrb[64].mxu1  ;;  %v3590_v5 = vpop.f32.mrb[65].mxu0 }
 0x189   :  { %1220 = vst.msk [vmem:[%s5320_s5 + $0xf8] sm:$0xff] %vm1188_vm0, %v1185_v36  ;;  %v3591_v7 = vadd.f32 %v3590_v5, %v3589_v3  ;;  %v3702_v8 = vpop.f32.mrb[65].mxu1  ;;  %v3592_v9 = vpop.f32.mrb[66].mxu0  ;;  %v4309_v36 = vld [vmem:[#allocation2 + $0x3c0] ss:$16 sps:$4 sm:$0xff]  }
 0x18a   :  { %v3703_v12 = vadd.f32 %v3702_v8, %v3701_v4  ;;  %v3704_v13 = vpop.f32.mrb[66].mxu1  ;;  %v3593_v14 = vpop.f32.mrb[67].mxu0 }
 0x18b   :  { %v3594_v16 = vadd.f32 %v3593_v14, %v3592_v9  ;;  %v3705_v17 = vpop.f32.mrb[67].mxu1 }
 0x18c   :  { %v1801_v18 = vadd.f32 %v3703_v12, %v3591_v7  ;;  %v3706_v19 = vadd.f32 %v3705_v17, %v3704_v13  ;;  %2594 = vmatmul.mubr.bf16.gmra.mrb[172].mxu0 %v4291_v6  ;;  %v4310_v6 = vld [vmem:[#allocation2 + $0x3c8] ss:$16 sps:$4 sm:$0xff]   ;;  %v4311_v7 = vld [vmem:[#allocation2 + $0x3e4] ss:$16 sps:$4 sm:$0xff]  }
 0x18d   :  { %2755 = vmatmul.mubr.bf16.gmra.mrb[172].mxu1 %v4292_v10  ;;  %2601 = vmatprep.mubr.bf16.mxu0 %v4293_v11  ;;  %v4313_v11 = vld [vmem:[#allocation2 + $0x3ec] ss:$16 sps:$4 sm:$0xff]  }
 0x18e   :  { %v3285_v20 = vpack.c.bf16 %v1801_v18, %v1801_v18  ;;  %v1804_v21 = vadd.f32 %v3706_v19, %v3594_v16  ;;  %2762 = vmatprep.mubr.bf16.mxu1 %v4295_v15 }
 0x18f   :  { %v3595_v22 = vpop.f32.mrb[68].mxu0 }
 0x190   :  { %2056 = vst.msk [vmem:[%s5319_s4] sm:$0xf] %vm2055_vm1, %v3285_v20  ;;  %v3286_v23 = vpack.c.bf16 %v1804_v21, %v1804_v21  ;;  %v3707_v24 = vpop.f32.mrb[68].mxu1  ;;  %v3596_v25 = vpop.f32.mrb[69].mxu0 }
 0x191   :  { %v3597_v27 = vadd.f32 %v3596_v25, %v3595_v22  ;;  %v3708_v28 = vpop.f32.mrb[69].mxu1  ;;  %v3598_v29 = vpop.f32.mrb[70].mxu0  ;;  %v4315_v22 = vld [vmem:[#allocation2 + $0x3e0] ss:$16 sps:$4 sm:$0xff]  }
 0x192   :  { %2057 = vst.msk [vmem:[%s5319_s4 + $0x4] sm:$0xf] %vm2055_vm1, %v3286_v23  ;;  %v3709_v32 = vadd.f32 %v3708_v28, %v3707_v24  ;;  %v3710_v37 = vpop.f32.mrb[70].mxu1  ;;  %v3599_v38 = vpop.f32.mrb[71].mxu0 }
 0x193   :  { %v3600_v40 = vadd.f32 %v3599_v38, %v3598_v29  ;;  %v3711_v41 = vpop.f32.mrb[71].mxu1 }
 0x194   :  { %v1809_v42 = vadd.f32 %v3709_v32, %v3597_v27  ;;  %v3712_v43 = vadd.f32 %v3711_v41, %v3710_v37  ;;  %2602 = vmatmul.mubr.bf16.gmra.mrb[176].mxu0 %v4297_v26  ;;  %v4316_v26 = vld [vmem:[#allocation2 + $0x3e8] ss:$16 sps:$4 sm:$0xff]  }
 0x195   :  { %2763 = vmatmul.mubr.bf16.gmra.mrb[176].mxu1 %v4298_v30  ;;  %2609 = vmatprep.mubr.bf16.mxu0 %v4299_v31 }
 0x196   :  { %v3287_v44 = vpack.c.bf16 %v1809_v42, %v1809_v42  ;;  %v1812_v45 = vadd.f32 %v3712_v43, %v3600_v40  ;;  %2770 = vmatprep.mubr.bf16.mxu1 %v4301_v39 }
 0x197   :  { %v3601_v46 = vpop.f32.mrb[72].mxu0 }
 0x198   :  { %2058 = vst.msk [vmem:[%s5319_s4 + $0x8] sm:$0xf] %vm2055_vm1, %v3287_v44  ;;  %v3288_v47 = vpack.c.bf16 %v1812_v45, %v1812_v45  ;;  %v3713_v48 = vpop.f32.mrb[72].mxu1  ;;  %v3602_v49 = vpop.f32.mrb[73].mxu0 }
 0x199   :  { %v3603_v51 = vadd.f32 %v3602_v49, %v3601_v46  ;;  %v3714_v52 = vpop.f32.mrb[73].mxu1  ;;  %v3604_v53 = vpop.f32.mrb[74].mxu0 }
 0x19a   :  { %2059 = vst.msk [vmem:[%s5319_s4 + $0xc] sm:$0xf] %vm2055_vm1, %v3288_v47  ;;  %v3715_v56 = vadd.f32 %v3714_v52, %v3713_v48  ;;  %v3716_v57 = vpop.f32.mrb[74].mxu1  ;;  %v3605_v58 = vpop.f32.mrb[75].mxu0 }
 0x19b   :  { %v3606_v60 = vadd.f32 %v3605_v58, %v3604_v53  ;;  %v3717_v61 = vpop.f32.mrb[75].mxu1 }
 0x19c   :  { %v1817_v62 = vadd.f32 %v3715_v56, %v3603_v51  ;;  %v3718_v63 = vadd.f32 %v3717_v61, %v3716_v57  ;;  %2610 = vmatmul.mubr.bf16.gmra.mrb[180].mxu0 %v4303_v50 }
 0x19d   :  { %2771 = vmatmul.mubr.bf16.gmra.mrb[180].mxu1 %v4304_v54  ;;  %2617 = vmatprep.mubr.bf16.mxu0 %v4305_v55 }
 0x19e   :  { %v3289_v0 = vpack.c.bf16 %v1817_v62, %v1817_v62  ;;  %v1820_v1 = vadd.f32 %v3718_v63, %v3606_v60  ;;  %2778 = vmatprep.mubr.bf16.mxu1 %v4307_v59 }
 0x19f   :  { %v3607_v2 = vpop.f32.mrb[76].mxu0 }
 0x1a0   :  { %2060 = vst.msk [vmem:[%s5319_s4 + $0x10] sm:$0xf] %vm2055_vm1, %v3289_v0  ;;  %v3290_v33 = vpack.c.bf16 %v1820_v1, %v1820_v1  ;;  %v3719_v34 = vpop.f32.mrb[76].mxu1  ;;  %v3608_v35 = vpop.f32.mrb[77].mxu0 }
 0x1a1   :  { %v3609_v3 = vadd.f32 %v3608_v35, %v3607_v2  ;;  %v3720_v4 = vpop.f32.mrb[77].mxu1  ;;  %v3610_v5 = vpop.f32.mrb[78].mxu0 }
 0x1a2   :  { %2061 = vst.msk [vmem:[%s5319_s4 + $0x14] sm:$0xf] %vm2055_vm1, %v3290_v33  ;;  %v3721_v8 = vadd.f32 %v3720_v4, %v3719_v34  ;;  %v3722_v9 = vpop.f32.mrb[78].mxu1  ;;  %v3611_v10 = vpop.f32.mrb[79].mxu0 }
 0x1a3   :  { %v3612_v12 = vadd.f32 %v3611_v10, %v3610_v5  ;;  %v3723_v13 = vpop.f32.mrb[79].mxu1 }
 0x1a4   :  { %v1825_v14 = vadd.f32 %v3721_v8, %v3609_v3  ;;  %v3724_v15 = vadd.f32 %v3723_v13, %v3722_v9  ;;  %2618 = vmatmul.mubr.bf16.gmra.mrb[184].mxu0 %v4309_v36 }
 0x1a5   :  { %2779 = vmatmul.mubr.bf16.gmra.mrb[184].mxu1 %v4310_v6  ;;  %2625 = vmatprep.mubr.bf16.mxu0 %v4311_v7 }
 0x1a6   :  { %v3291_v16 = vpack.c.bf16 %v1825_v14, %v1825_v14  ;;  %v1828_v17 = vadd.f32 %v3724_v15, %v3612_v12  ;;  %2786 = vmatprep.mubr.bf16.mxu1 %v4313_v11 }
 0x1a7   :  { %v3613_v18 = vpop.f32.mrb[80].mxu0 }
 0x1a8   :  { %2062 = vst.msk [vmem:[%s5319_s4 + $0x18] sm:$0xf] %vm2055_vm1, %v3291_v16  ;;  %v3292_v19 = vpack.c.bf16 %v1828_v17, %v1828_v17  ;;  %v3725_v20 = vpop.f32.mrb[80].mxu1  ;;  %v3614_v21 = vpop.f32.mrb[81].mxu0 }
 0x1a9   :  { %v3615_v23 = vadd.f32 %v3614_v21, %v3613_v18  ;;  %v3726_v24 = vpop.f32.mrb[81].mxu1  ;;  %v3616_v25 = vpop.f32.mrb[82].mxu0 }
 0x1aa   :  { %2063 = vst.msk [vmem:[%s5319_s4 + $0x1c] sm:$0xf] %vm2055_vm1, %v3292_v19  ;;  %v3727_v27 = vadd.f32 %v3726_v24, %v3725_v20  ;;  %v3728_v28 = vpop.f32.mrb[82].mxu1  ;;  %v3617_v29 = vpop.f32.mrb[83].mxu0 }
 0x1ab   :  { %v3618_v30 = vadd.f32 %v3617_v29, %v3616_v25  ;;  %v3729_v31 = vpop.f32.mrb[83].mxu1 }
 0x1ac   :  { %v1833_v32 = vadd.f32 %v3727_v27, %v3615_v23  ;;  %v3730_v37 = vadd.f32 %v3729_v31, %v3728_v28  ;;  %2626 = vmatmul.mubr.bf16.gmra.mrb[188].mxu0 %v4315_v22 }
 0x1ad   :  { %2787 = vmatmul.mubr.bf16.gmra.mrb[188].mxu1 %v4316_v26 }
 0x1ae   :  { %v3293_v38 = vpack.c.bf16 %v1833_v32, %v1833_v32  ;;  %v1836_v39 = vadd.f32 %v3730_v37, %v3618_v30 }
 0x1af   :  { %v3619_v40 = vpop.f32.mrb[84].mxu0 }
 0x1b0   :  { %2064 = vst.msk [vmem:[%s5319_s4 + $0x20] sm:$0xf] %vm2055_vm1, %v3293_v38  ;;  %v3294_v41 = vpack.c.bf16 %v1836_v39, %v1836_v39  ;;  %v3731_v42 = vpop.f32.mrb[84].mxu1  ;;  %v3620_v43 = vpop.f32.mrb[85].mxu0 }
 0x1b1   :  { %v3621_v44 = vadd.f32 %v3620_v43, %v3619_v40  ;;  %v3732_v45 = vpop.f32.mrb[85].mxu1  ;;  %v3622_v46 = vpop.f32.mrb[86].mxu0 }
 0x1b2   :  { %2065 = vst.msk [vmem:[%s5319_s4 + $0x24] sm:$0xf] %vm2055_vm1, %v3294_v41  ;;  %v3733_v47 = vadd.f32 %v3732_v45, %v3731_v42  ;;  %v3734_v48 = vpop.f32.mrb[86].mxu1  ;;  %v3623_v49 = vpop.f32.mrb[87].mxu0 }
 0x1b3   :  { %v3624_v50 = vadd.f32 %v3623_v49, %v3622_v46  ;;  %v3735_v51 = vpop.f32.mrb[87].mxu1 }
 0x1b4   :  { %v1841_v52 = vadd.f32 %v3733_v47, %v3621_v44  ;;  %v3736_v53 = vadd.f32 %v3735_v51, %v3734_v48 }
 0x1b6   :  { %v3295_v54 = vpack.c.bf16 %v1841_v52, %v1841_v52  ;;  %v1844_v55 = vadd.f32 %v3736_v53, %v3624_v50 }
 0x1b7   :  { %v3625_v56 = vpop.f32.mrb[88].mxu0 }
 0x1b8   :  { %2066 = vst.msk [vmem:[%s5319_s4 + $0x28] sm:$0xf] %vm2055_vm1, %v3295_v54  ;;  %v3296_v57 = vpack.c.bf16 %v1844_v55, %v1844_v55  ;;  %v3737_v58 = vpop.f32.mrb[88].mxu1  ;;  %v3626_v59 = vpop.f32.mrb[89].mxu0 }
 0x1b9   :  { %v3627_v60 = vadd.f32 %v3626_v59, %v3625_v56  ;;  %v3738_v61 = vpop.f32.mrb[89].mxu1  ;;  %v3628_v62 = vpop.f32.mrb[90].mxu0 }
 0x1ba   :  { %2067 = vst.msk [vmem:[%s5319_s4 + $0x2c] sm:$0xf] %vm2055_vm1, %v3296_v57  ;;  %v3739_v63 = vadd.f32 %v3738_v61, %v3737_v58  ;;  %v3740_v0 = vpop.f32.mrb[90].mxu1  ;;  %v3629_v1 = vpop.f32.mrb[91].mxu0 }
 0x1bb   :  { %v3630_v2 = vadd.f32 %v3629_v1, %v3628_v62  ;;  %v3741_v33 = vpop.f32.mrb[91].mxu1 }
 0x1bc   :  { %v1849_v34 = vadd.f32 %v3739_v63, %v3627_v60  ;;  %v3742_v35 = vadd.f32 %v3741_v33, %v3740_v0 }
 0x1be   :  { %v3297_v36 = vpack.c.bf16 %v1849_v34, %v1849_v34  ;;  %v1852_v3 = vadd.f32 %v3742_v35, %v3630_v2 }
 0x1bf   :  { %v3631_v4 = vpop.f32.mrb[92].mxu0 }
 0x1c0   :  { %2068 = vst.msk [vmem:[%s5319_s4 + $0x30] sm:$0xf] %vm2055_vm1, %v3297_v36  ;;  %v3298_v5 = vpack.c.bf16 %v1852_v3, %v1852_v3  ;;  %v3743_v6 = vpop.f32.mrb[92].mxu1  ;;  %v3632_v7 = vpop.f32.mrb[93].mxu0 }
 0x1c1   :  { %v3633_v8 = vadd.f32 %v3632_v7, %v3631_v4  ;;  %v3744_v9 = vpop.f32.mrb[93].mxu1  ;;  %v3634_v10 = vpop.f32.mrb[94].mxu0 }
 0x1c2   :  { %2069 = vst.msk [vmem:[%s5319_s4 + $0x34] sm:$0xf] %vm2055_vm1, %v3298_v5  ;;  %v3745_v11 = vadd.f32 %v3744_v9, %v3743_v6  ;;  %v3746_v12 = vpop.f32.mrb[94].mxu1  ;;  %v3635_v13 = vpop.f32.mrb[95].mxu0 }
 0x1c3   :  { %v3636_v14 = vadd.f32 %v3635_v13, %v3634_v10  ;;  %v3747_v15 = vpop.f32.mrb[95].mxu1 }
 0x1c4   :  { %v1857_v16 = vadd.f32 %v3745_v11, %v3633_v8  ;;  %v3748_v17 = vadd.f32 %v3747_v15, %v3746_v12 }
 0x1c6   :  { %v3299_v18 = vpack.c.bf16 %v1857_v16, %v1857_v16  ;;  %v1860_v19 = vadd.f32 %v3748_v17, %v3636_v14 }
 0x1c7   :  { %v3637_v20 = vpop.f32.mrb[96].mxu0 }
 0x1c8   :  { %2070 = vst.msk [vmem:[%s5319_s4 + $0x38] sm:$0xf] %vm2055_vm1, %v3299_v18  ;;  %v3300_v21 = vpack.c.bf16 %v1860_v19, %v1860_v19  ;;  %v3749_v22 = vpop.f32.mrb[96].mxu1  ;;  %v3638_v23 = vpop.f32.mrb[97].mxu0 }
 0x1c9   :  { %v3639_v24 = vadd.f32 %v3638_v23, %v3637_v20  ;;  %v3750_v25 = vpop.f32.mrb[97].mxu1  ;;  %v3640_v26 = vpop.f32.mrb[98].mxu0 }
 0x1ca   :  { %2071 = vst.msk [vmem:[%s5319_s4 + $0x3c] sm:$0xf] %vm2055_vm1, %v3300_v21  ;;  %v3751_v27 = vadd.f32 %v3750_v25, %v3749_v22  ;;  %v3752_v28 = vpop.f32.mrb[98].mxu1  ;;  %v3641_v29 = vpop.f32.mrb[99].mxu0 }
 0x1cb   :  { %v3642_v30 = vadd.f32 %v3641_v29, %v3640_v26  ;;  %v3753_v31 = vpop.f32.mrb[99].mxu1 }
 0x1cc   :  { %v1865_v32 = vadd.f32 %v3751_v27, %v3639_v24  ;;  %v3754_v37 = vadd.f32 %v3753_v31, %v3752_v28 }
 0x1ce   :  { %v3301_v38 = vpack.c.bf16 %v1865_v32, %v1865_v32  ;;  %v1868_v39 = vadd.f32 %v3754_v37, %v3642_v30 }
 0x1cf   :  { %v3643_v40 = vpop.f32.mrb[100].mxu0 }
 0x1d0   :  { %2072 = vst.msk [vmem:[%s5319_s4 + $0x40] sm:$0xf] %vm2055_vm1, %v3301_v38  ;;  %v3302_v41 = vpack.c.bf16 %v1868_v39, %v1868_v39  ;;  %v3755_v42 = vpop.f32.mrb[100].mxu1  ;;  %v3644_v43 = vpop.f32.mrb[101].mxu0 }
 0x1d1   :  { %v3645_v44 = vadd.f32 %v3644_v43, %v3643_v40  ;;  %v3756_v45 = vpop.f32.mrb[101].mxu1  ;;  %v3646_v46 = vpop.f32.mrb[102].mxu0 }
 0x1d2   :  { %2073 = vst.msk [vmem:[%s5319_s4 + $0x44] sm:$0xf] %vm2055_vm1, %v3302_v41  ;;  %v3757_v47 = vadd.f32 %v3756_v45, %v3755_v42  ;;  %v3758_v48 = vpop.f32.mrb[102].mxu1  ;;  %v3647_v49 = vpop.f32.mrb[103].mxu0 }
 0x1d3   :  { %v3648_v50 = vadd.f32 %v3647_v49, %v3646_v46  ;;  %v3759_v51 = vpop.f32.mrb[103].mxu1 }
 0x1d4   :  { %v1873_v52 = vadd.f32 %v3757_v47, %v3645_v44  ;;  %v3760_v53 = vadd.f32 %v3759_v51, %v3758_v48 }
 0x1d6   :  { %v3303_v54 = vpack.c.bf16 %v1873_v52, %v1873_v52  ;;  %v1876_v55 = vadd.f32 %v3760_v53, %v3648_v50 }
 0x1d7   :  { %v3649_v56 = vpop.f32.mrb[104].mxu0 }
 0x1d8   :  { %2074 = vst.msk [vmem:[%s5319_s4 + $0x48] sm:$0xf] %vm2055_vm1, %v3303_v54  ;;  %v3304_v57 = vpack.c.bf16 %v1876_v55, %v1876_v55  ;;  %v3761_v58 = vpop.f32.mrb[104].mxu1  ;;  %v3650_v59 = vpop.f32.mrb[105].mxu0 }
 0x1d9   :  { %v3651_v60 = vadd.f32 %v3650_v59, %v3649_v56  ;;  %v3762_v61 = vpop.f32.mrb[105].mxu1  ;;  %v3652_v62 = vpop.f32.mrb[106].mxu0 }
 0x1da   :  { %2075 = vst.msk [vmem:[%s5319_s4 + $0x4c] sm:$0xf] %vm2055_vm1, %v3304_v57  ;;  %v3763_v63 = vadd.f32 %v3762_v61, %v3761_v58  ;;  %v3764_v0 = vpop.f32.mrb[106].mxu1  ;;  %v3653_v1 = vpop.f32.mrb[107].mxu0 }
 0x1db   :  { %v3654_v2 = vadd.f32 %v3653_v1, %v3652_v62  ;;  %v3765_v33 = vpop.f32.mrb[107].mxu1 }
 0x1dc   :  { %v1881_v34 = vadd.f32 %v3763_v63, %v3651_v60  ;;  %v3766_v35 = vadd.f32 %v3765_v33, %v3764_v0 }
 0x1de   :  { %v3305_v36 = vpack.c.bf16 %v1881_v34, %v1881_v34  ;;  %v1884_v3 = vadd.f32 %v3766_v35, %v3654_v2 }
 0x1df   :  { %v3655_v4 = vpop.f32.mrb[108].mxu0 }
 0x1e0   :  { %2076 = vst.msk [vmem:[%s5319_s4 + $0x50] sm:$0xf] %vm2055_vm1, %v3305_v36  ;;  %v3306_v5 = vpack.c.bf16 %v1884_v3, %v1884_v3  ;;  %v3767_v6 = vpop.f32.mrb[108].mxu1  ;;  %v3656_v7 = vpop.f32.mrb[109].mxu0 }
 0x1e1   :  { %v3657_v8 = vadd.f32 %v3656_v7, %v3655_v4  ;;  %v3768_v9 = vpop.f32.mrb[109].mxu1  ;;  %v3658_v10 = vpop.f32.mrb[110].mxu0 }
 0x1e2   :  { %2077 = vst.msk [vmem:[%s5319_s4 + $0x54] sm:$0xf] %vm2055_vm1, %v3306_v5  ;;  %v3769_v11 = vadd.f32 %v3768_v9, %v3767_v6  ;;  %v3770_v12 = vpop.f32.mrb[110].mxu1  ;;  %v3659_v13 = vpop.f32.mrb[111].mxu0 }
 0x1e3   :  { %v3660_v14 = vadd.f32 %v3659_v13, %v3658_v10  ;;  %v3771_v15 = vpop.f32.mrb[111].mxu1 }
 0x1e4   :  { %v1889_v16 = vadd.f32 %v3769_v11, %v3657_v8  ;;  %v3772_v17 = vadd.f32 %v3771_v15, %v3770_v12 }
 0x1e6   :  { %v3307_v18 = vpack.c.bf16 %v1889_v16, %v1889_v16  ;;  %v1892_v19 = vadd.f32 %v3772_v17, %v3660_v14 }
 0x1e7   :  { %v3661_v20 = vpop.f32.mrb[112].mxu0 }
 0x1e8   :  { %2078 = vst.msk [vmem:[%s5319_s4 + $0x58] sm:$0xf] %vm2055_vm1, %v3307_v18  ;;  %v3308_v21 = vpack.c.bf16 %v1892_v19, %v1892_v19  ;;  %v3773_v22 = vpop.f32.mrb[112].mxu1  ;;  %v3662_v23 = vpop.f32.mrb[113].mxu0 }
 0x1e9   :  { %v3663_v24 = vadd.f32 %v3662_v23, %v3661_v20  ;;  %v3774_v25 = vpop.f32.mrb[113].mxu1  ;;  %v3664_v26 = vpop.f32.mrb[114].mxu0 }
 0x1ea   :  { %2079 = vst.msk [vmem:[%s5319_s4 + $0x5c] sm:$0xf] %vm2055_vm1, %v3308_v21  ;;  %v3775_v27 = vadd.f32 %v3774_v25, %v3773_v22  ;;  %v3776_v28 = vpop.f32.mrb[114].mxu1  ;;  %v3665_v29 = vpop.f32.mrb[115].mxu0 }
 0x1eb   :  { %v3666_v30 = vadd.f32 %v3665_v29, %v3664_v26  ;;  %v3777_v31 = vpop.f32.mrb[115].mxu1 }
 0x1ec   :  { %v1897_v32 = vadd.f32 %v3775_v27, %v3663_v24  ;;  %v3778_v37 = vadd.f32 %v3777_v31, %v3776_v28 }
 0x1ee   :  { %v3309_v38 = vpack.c.bf16 %v1897_v32, %v1897_v32  ;;  %v1900_v39 = vadd.f32 %v3778_v37, %v3666_v30 }
 0x1ef   :  { %v3667_v40 = vpop.f32.mrb[116].mxu0 }
 0x1f0   :  { %2080 = vst.msk [vmem:[%s5319_s4 + $0x60] sm:$0xf] %vm2055_vm1, %v3309_v38  ;;  %v3310_v41 = vpack.c.bf16 %v1900_v39, %v1900_v39  ;;  %v3779_v42 = vpop.f32.mrb[116].mxu1  ;;  %v3668_v43 = vpop.f32.mrb[117].mxu0 }
 0x1f1   :  { %v3669_v44 = vadd.f32 %v3668_v43, %v3667_v40  ;;  %v3780_v45 = vpop.f32.mrb[117].mxu1  ;;  %v3670_v46 = vpop.f32.mrb[118].mxu0 }
 0x1f2   :  { %2081 = vst.msk [vmem:[%s5319_s4 + $0x64] sm:$0xf] %vm2055_vm1, %v3310_v41  ;;  %v3781_v47 = vadd.f32 %v3780_v45, %v3779_v42  ;;  %v3782_v48 = vpop.f32.mrb[118].mxu1  ;;  %v3671_v49 = vpop.f32.mrb[119].mxu0 }
 0x1f3   :  { %v3672_v50 = vadd.f32 %v3671_v49, %v3670_v46  ;;  %v3783_v51 = vpop.f32.mrb[119].mxu1 }
 0x1f4   :  { %v1905_v52 = vadd.f32 %v3781_v47, %v3669_v44  ;;  %v3784_v53 = vadd.f32 %v3783_v51, %v3782_v48 }
 0x1f6   :  { %v3311_v54 = vpack.c.bf16 %v1905_v52, %v1905_v52  ;;  %v1908_v55 = vadd.f32 %v3784_v53, %v3672_v50 }
 0x1f7   :  { %v3673_v56 = vpop.f32.mrb[120].mxu0 }
 0x1f8   :  { %2082 = vst.msk [vmem:[%s5319_s4 + $0x68] sm:$0xf] %vm2055_vm1, %v3311_v54  ;;  %v3312_v57 = vpack.c.bf16 %v1908_v55, %v1908_v55  ;;  %v3785_v58 = vpop.f32.mrb[120].mxu1  ;;  %v3674_v59 = vpop.f32.mrb[121].mxu0 }
 0x1f9   :  { %v3675_v60 = vadd.f32 %v3674_v59, %v3673_v56  ;;  %v3786_v61 = vpop.f32.mrb[121].mxu1  ;;  %v3676_v62 = vpop.f32.mrb[122].mxu0 }
 0x1fa   :  { %2083 = vst.msk [vmem:[%s5319_s4 + $0x6c] sm:$0xf] %vm2055_vm1, %v3312_v57  ;;  %v3787_v63 = vadd.f32 %v3786_v61, %v3785_v58  ;;  %v3788_v0 = vpop.f32.mrb[122].mxu1  ;;  %v3677_v1 = vpop.f32.mrb[123].mxu0 }
 0x1fb   :  { %v3678_v2 = vadd.f32 %v3677_v1, %v3676_v62  ;;  %v3789_v33 = vpop.f32.mrb[123].mxu1 }
 0x1fc   :  { %v1913_v34 = vadd.f32 %v3787_v63, %v3675_v60  ;;  %v3790_v35 = vadd.f32 %v3789_v33, %v3788_v0 }
 0x1fe   :  { %v3313_v36 = vpack.c.bf16 %v1913_v34, %v1913_v34  ;;  %v1916_v3 = vadd.f32 %v3790_v35, %v3678_v2 }
 0x1ff   :  { %v3679_v4 = vpop.f32.mrb[124].mxu0 }
 0x200   :  { %2084 = vst.msk [vmem:[%s5319_s4 + $0x70] sm:$0xf] %vm2055_vm1, %v3313_v36  ;;  %v3314_v5 = vpack.c.bf16 %v1916_v3, %v1916_v3  ;;  %v3791_v6 = vpop.f32.mrb[124].mxu1  ;;  %v3680_v7 = vpop.f32.mrb[125].mxu0 }
 0x201   :  { %v3681_v8 = vadd.f32 %v3680_v7, %v3679_v4  ;;  %v3792_v9 = vpop.f32.mrb[125].mxu1  ;;  %v3682_v10 = vpop.f32.mrb[126].mxu0 }
 0x202   :  { %2085 = vst.msk [vmem:[%s5319_s4 + $0x74] sm:$0xf] %vm2055_vm1, %v3314_v5  ;;  %v3793_v11 = vadd.f32 %v3792_v9, %v3791_v6  ;;  %v3794_v12 = vpop.f32.mrb[126].mxu1  ;;  %v3683_v13 = vpop.f32.mrb[127].mxu0 }
 0x203   :  { %v3684_v14 = vadd.f32 %v3683_v13, %v3682_v10  ;;  %v3795_v15 = vpop.f32.mrb[127].mxu1 }
 0x204   :  { %v1921_v16 = vadd.f32 %v3793_v11, %v3681_v8  ;;  %v3796_v17 = vadd.f32 %v3795_v15, %v3794_v12 }
 0x206   :  { %v3315_v18 = vpack.c.bf16 %v1921_v16, %v1921_v16  ;;  %v1924_v19 = vadd.f32 %v3796_v17, %v3684_v14 }
 0x207   :  { %v3813_v20 = vpop.f32.mrb[128].mxu0 }
 0x208   :  { %2086 = vst.msk [vmem:[%s5319_s4 + $0x78] sm:$0xf] %vm2055_vm1, %v3315_v18  ;;  %v3316_v21 = vpack.c.bf16 %v1924_v19, %v1924_v19  ;;  %v3925_v22 = vpop.f32.mrb[128].mxu1  ;;  %v3814_v23 = vpop.f32.mrb[129].mxu0 }
 0x209   :  { %v3815_v24 = vadd.f32 %v3814_v23, %v3813_v20  ;;  %v3926_v25 = vpop.f32.mrb[129].mxu1  ;;  %v3816_v26 = vpop.f32.mrb[130].mxu0 }
 0x20a   :  { %2087 = vst.msk [vmem:[%s5319_s4 + $0x7c] sm:$0xf] %vm2055_vm1, %v3316_v21  ;;  %v3927_v27 = vadd.f32 %v3926_v25, %v3925_v22  ;;  %v3928_v28 = vpop.f32.mrb[130].mxu1  ;;  %v3817_v29 = vpop.f32.mrb[131].mxu0 }
 0x20b   :  { %v3818_v30 = vadd.f32 %v3817_v29, %v3816_v26  ;;  %v3929_v31 = vpop.f32.mrb[131].mxu1 }
 0x20c   :  { %v2669_v32 = vadd.f32 %v3927_v27, %v3815_v24  ;;  %v3930_v37 = vadd.f32 %v3929_v31, %v3928_v28 }
 0x20e   :  { %v3317_v38 = vpack.c.bf16 %v2669_v32, %v2669_v32  ;;  %v2672_v39 = vadd.f32 %v3930_v37, %v3818_v30 }
 0x20f   :  { %v3819_v40 = vpop.f32.mrb[132].mxu0 }
 0x210   :  { %3253 = vst.msk [vmem:[%s5319_s4 + $0x80] sm:$0xf] %vm2055_vm1, %v3317_v38  ;;  %v3318_v41 = vpack.c.bf16 %v2672_v39, %v2672_v39  ;;  %v3931_v42 = vpop.f32.mrb[132].mxu1  ;;  %v3820_v43 = vpop.f32.mrb[133].mxu0 }
 0x211   :  { %v3821_v44 = vadd.f32 %v3820_v43, %v3819_v40  ;;  %v3932_v45 = vpop.f32.mrb[133].mxu1  ;;  %v3822_v46 = vpop.f32.mrb[134].mxu0 }
 0x212   :  { %3254 = vst.msk [vmem:[%s5319_s4 + $0x84] sm:$0xf] %vm2055_vm1, %v3318_v41  ;;  %v3933_v47 = vadd.f32 %v3932_v45, %v3931_v42  ;;  %v3934_v48 = vpop.f32.mrb[134].mxu1  ;;  %v3823_v49 = vpop.f32.mrb[135].mxu0 }
 0x213   :  { %v3824_v50 = vadd.f32 %v3823_v49, %v3822_v46  ;;  %v3935_v51 = vpop.f32.mrb[135].mxu1 }
 0x214   :  { %v2677_v52 = vadd.f32 %v3933_v47, %v3821_v44  ;;  %v3936_v53 = vadd.f32 %v3935_v51, %v3934_v48 }
 0x216   :  { %v3319_v54 = vpack.c.bf16 %v2677_v52, %v2677_v52  ;;  %v2680_v55 = vadd.f32 %v3936_v53, %v3824_v50 }
 0x217   :  { %v3825_v56 = vpop.f32.mrb[136].mxu0 }
 0x218   :  { %3255 = vst.msk [vmem:[%s5319_s4 + $0x88] sm:$0xf] %vm2055_vm1, %v3319_v54  ;;  %v3320_v57 = vpack.c.bf16 %v2680_v55, %v2680_v55  ;;  %v3937_v58 = vpop.f32.mrb[136].mxu1  ;;  %v3826_v59 = vpop.f32.mrb[137].mxu0 }
 0x219   :  { %v3827_v60 = vadd.f32 %v3826_v59, %v3825_v56  ;;  %v3938_v61 = vpop.f32.mrb[137].mxu1  ;;  %v3828_v62 = vpop.f32.mrb[138].mxu0 }
 0x21a   :  { %3256 = vst.msk [vmem:[%s5319_s4 + $0x8c] sm:$0xf] %vm2055_vm1, %v3320_v57  ;;  %v3939_v63 = vadd.f32 %v3938_v61, %v3937_v58  ;;  %v3940_v0 = vpop.f32.mrb[138].mxu1  ;;  %v3829_v1 = vpop.f32.mrb[139].mxu0 }
 0x21b   :  { %v3830_v2 = vadd.f32 %v3829_v1, %v3828_v62  ;;  %v3941_v33 = vpop.f32.mrb[139].mxu1 }
 0x21c   :  { %v2685_v34 = vadd.f32 %v3939_v63, %v3827_v60  ;;  %v3942_v35 = vadd.f32 %v3941_v33, %v3940_v0 }
 0x21e   :  { %v3321_v36 = vpack.c.bf16 %v2685_v34, %v2685_v34  ;;  %v2688_v3 = vadd.f32 %v3942_v35, %v3830_v2 }
 0x21f   :  { %v3831_v4 = vpop.f32.mrb[140].mxu0 }
 0x220   :  { %3257 = vst.msk [vmem:[%s5319_s4 + $0x90] sm:$0xf] %vm2055_vm1, %v3321_v36  ;;  %v3322_v5 = vpack.c.bf16 %v2688_v3, %v2688_v3  ;;  %v3943_v6 = vpop.f32.mrb[140].mxu1  ;;  %v3832_v7 = vpop.f32.mrb[141].mxu0 }
 0x221   :  { %v3833_v8 = vadd.f32 %v3832_v7, %v3831_v4  ;;  %v3944_v9 = vpop.f32.mrb[141].mxu1  ;;  %v3834_v10 = vpop.f32.mrb[142].mxu0 }
 0x222   :  { %3258 = vst.msk [vmem:[%s5319_s4 + $0x94] sm:$0xf] %vm2055_vm1, %v3322_v5  ;;  %v3945_v11 = vadd.f32 %v3944_v9, %v3943_v6  ;;  %v3946_v12 = vpop.f32.mrb[142].mxu1  ;;  %v3835_v13 = vpop.f32.mrb[143].mxu0 }
 0x223   :  { %v3836_v14 = vadd.f32 %v3835_v13, %v3834_v10  ;;  %v3947_v15 = vpop.f32.mrb[143].mxu1 }
 0x224   :  { %v2693_v16 = vadd.f32 %v3945_v11, %v3833_v8  ;;  %v3948_v17 = vadd.f32 %v3947_v15, %v3946_v12 }
 0x226   :  { %v3323_v18 = vpack.c.bf16 %v2693_v16, %v2693_v16  ;;  %v2696_v19 = vadd.f32 %v3948_v17, %v3836_v14 }
 0x227   :  { %v3837_v20 = vpop.f32.mrb[144].mxu0 }
 0x228   :  { %3259 = vst.msk [vmem:[%s5319_s4 + $0x98] sm:$0xf] %vm2055_vm1, %v3323_v18  ;;  %v3324_v21 = vpack.c.bf16 %v2696_v19, %v2696_v19  ;;  %v3949_v22 = vpop.f32.mrb[144].mxu1  ;;  %v3838_v23 = vpop.f32.mrb[145].mxu0 }
 0x229   :  { %v3839_v24 = vadd.f32 %v3838_v23, %v3837_v20  ;;  %v3950_v25 = vpop.f32.mrb[145].mxu1  ;;  %v3840_v26 = vpop.f32.mrb[146].mxu0 }
 0x22a   :  { %3260 = vst.msk [vmem:[%s5319_s4 + $0x9c] sm:$0xf] %vm2055_vm1, %v3324_v21  ;;  %v3951_v27 = vadd.f32 %v3950_v25, %v3949_v22  ;;  %v3952_v28 = vpop.f32.mrb[146].mxu1  ;;  %v3841_v29 = vpop.f32.mrb[147].mxu0 }
 0x22b   :  { %v3842_v30 = vadd.f32 %v3841_v29, %v3840_v26  ;;  %v3953_v31 = vpop.f32.mrb[147].mxu1 }
 0x22c   :  { %v2701_v32 = vadd.f32 %v3951_v27, %v3839_v24  ;;  %v3954_v37 = vadd.f32 %v3953_v31, %v3952_v28 }
 0x22e   :  { %v3325_v38 = vpack.c.bf16 %v2701_v32, %v2701_v32  ;;  %v2704_v39 = vadd.f32 %v3954_v37, %v3842_v30 }
 0x22f   :  { %v3843_v40 = vpop.f32.mrb[148].mxu0 }
 0x230   :  { %3261 = vst.msk [vmem:[%s5319_s4 + $0xa0] sm:$0xf] %vm2055_vm1, %v3325_v38  ;;  %v3326_v41 = vpack.c.bf16 %v2704_v39, %v2704_v39  ;;  %v3955_v42 = vpop.f32.mrb[148].mxu1  ;;  %v3844_v43 = vpop.f32.mrb[149].mxu0 }
 0x231   :  { %v3845_v44 = vadd.f32 %v3844_v43, %v3843_v40  ;;  %v3956_v45 = vpop.f32.mrb[149].mxu1  ;;  %v3846_v46 = vpop.f32.mrb[150].mxu0 }
 0x232   :  { %3262 = vst.msk [vmem:[%s5319_s4 + $0xa4] sm:$0xf] %vm2055_vm1, %v3326_v41  ;;  %v3957_v47 = vadd.f32 %v3956_v45, %v3955_v42  ;;  %v3958_v48 = vpop.f32.mrb[150].mxu1  ;;  %v3847_v49 = vpop.f32.mrb[151].mxu0 }
 0x233   :  { %v3848_v50 = vadd.f32 %v3847_v49, %v3846_v46  ;;  %v3959_v51 = vpop.f32.mrb[151].mxu1 }
 0x234   :  { %v2709_v52 = vadd.f32 %v3957_v47, %v3845_v44  ;;  %v3960_v53 = vadd.f32 %v3959_v51, %v3958_v48 }
 0x236   :  { %v3327_v54 = vpack.c.bf16 %v2709_v52, %v2709_v52  ;;  %v2712_v55 = vadd.f32 %v3960_v53, %v3848_v50 }
 0x237   :  { %v3849_v56 = vpop.f32.mrb[152].mxu0 }
 0x238   :  { %3263 = vst.msk [vmem:[%s5319_s4 + $0xa8] sm:$0xf] %vm2055_vm1, %v3327_v54  ;;  %v3328_v57 = vpack.c.bf16 %v2712_v55, %v2712_v55  ;;  %v3961_v58 = vpop.f32.mrb[152].mxu1  ;;  %v3850_v59 = vpop.f32.mrb[153].mxu0 }
 0x239   :  { %v3851_v60 = vadd.f32 %v3850_v59, %v3849_v56  ;;  %v3962_v61 = vpop.f32.mrb[153].mxu1  ;;  %v3852_v62 = vpop.f32.mrb[154].mxu0 }
 0x23a   :  { %3264 = vst.msk [vmem:[%s5319_s4 + $0xac] sm:$0xf] %vm2055_vm1, %v3328_v57  ;;  %v3963_v63 = vadd.f32 %v3962_v61, %v3961_v58  ;;  %v3964_v0 = vpop.f32.mrb[154].mxu1  ;;  %v3853_v1 = vpop.f32.mrb[155].mxu0 }
 0x23b   :  { %v3854_v2 = vadd.f32 %v3853_v1, %v3852_v62  ;;  %v3965_v33 = vpop.f32.mrb[155].mxu1 }
 0x23c   :  { %v2717_v34 = vadd.f32 %v3963_v63, %v3851_v60  ;;  %v3966_v35 = vadd.f32 %v3965_v33, %v3964_v0 }
 0x23e   :  { %v3329_v36 = vpack.c.bf16 %v2717_v34, %v2717_v34  ;;  %v2720_v3 = vadd.f32 %v3966_v35, %v3854_v2 }
 0x23f   :  { %v3855_v4 = vpop.f32.mrb[156].mxu0 }
 0x240   :  { %3265 = vst.msk [vmem:[%s5319_s4 + $0xb0] sm:$0xf] %vm2055_vm1, %v3329_v36  ;;  %v3330_v5 = vpack.c.bf16 %v2720_v3, %v2720_v3  ;;  %v3967_v6 = vpop.f32.mrb[156].mxu1  ;;  %v3856_v7 = vpop.f32.mrb[157].mxu0 }
 0x241   :  { %v3857_v8 = vadd.f32 %v3856_v7, %v3855_v4  ;;  %v3968_v9 = vpop.f32.mrb[157].mxu1  ;;  %v3858_v10 = vpop.f32.mrb[158].mxu0 }
 0x242   :  { %3266 = vst.msk [vmem:[%s5319_s4 + $0xb4] sm:$0xf] %vm2055_vm1, %v3330_v5  ;;  %v3969_v11 = vadd.f32 %v3968_v9, %v3967_v6  ;;  %v3970_v12 = vpop.f32.mrb[158].mxu1  ;;  %v3859_v13 = vpop.f32.mrb[159].mxu0 }
 0x243   :  { %v3860_v14 = vadd.f32 %v3859_v13, %v3858_v10  ;;  %v3971_v15 = vpop.f32.mrb[159].mxu1 }
 0x244   :  { %v2725_v16 = vadd.f32 %v3969_v11, %v3857_v8  ;;  %v3972_v17 = vadd.f32 %v3971_v15, %v3970_v12 }
 0x246   :  { %v3331_v18 = vpack.c.bf16 %v2725_v16, %v2725_v16  ;;  %v2728_v19 = vadd.f32 %v3972_v17, %v3860_v14 }
 0x247   :  { %v3861_v20 = vpop.f32.mrb[160].mxu0 }
 0x248   :  { %3267 = vst.msk [vmem:[%s5319_s4 + $0xb8] sm:$0xf] %vm2055_vm1, %v3331_v18  ;;  %v3332_v21 = vpack.c.bf16 %v2728_v19, %v2728_v19  ;;  %v3973_v22 = vpop.f32.mrb[160].mxu1  ;;  %v3862_v23 = vpop.f32.mrb[161].mxu0 }
 0x249   :  { %v3863_v24 = vadd.f32 %v3862_v23, %v3861_v20  ;;  %v3974_v25 = vpop.f32.mrb[161].mxu1  ;;  %v3864_v26 = vpop.f32.mrb[162].mxu0 }
 0x24a   :  { %3268 = vst.msk [vmem:[%s5319_s4 + $0xbc] sm:$0xf] %vm2055_vm1, %v3332_v21  ;;  %v3975_v27 = vadd.f32 %v3974_v25, %v3973_v22  ;;  %v3976_v28 = vpop.f32.mrb[162].mxu1  ;;  %v3865_v29 = vpop.f32.mrb[163].mxu0 }
 0x24b   :  { %v3866_v30 = vadd.f32 %v3865_v29, %v3864_v26  ;;  %v3977_v31 = vpop.f32.mrb[163].mxu1 }
 0x24c   :  { %v2733_v32 = vadd.f32 %v3975_v27, %v3863_v24  ;;  %v3978_v37 = vadd.f32 %v3977_v31, %v3976_v28 }
 0x24e   :  { %v3333_v38 = vpack.c.bf16 %v2733_v32, %v2733_v32  ;;  %v2736_v39 = vadd.f32 %v3978_v37, %v3866_v30 }
 0x24f   :  { %v3867_v40 = vpop.f32.mrb[164].mxu0 }
 0x250   :  { %3269 = vst.msk [vmem:[%s5319_s4 + $0xc0] sm:$0xf] %vm2055_vm1, %v3333_v38  ;;  %v3334_v41 = vpack.c.bf16 %v2736_v39, %v2736_v39  ;;  %v3979_v42 = vpop.f32.mrb[164].mxu1  ;;  %v3868_v43 = vpop.f32.mrb[165].mxu0 }
 0x251   :  { %v3869_v44 = vadd.f32 %v3868_v43, %v3867_v40  ;;  %v3980_v45 = vpop.f32.mrb[165].mxu1  ;;  %v3870_v46 = vpop.f32.mrb[166].mxu0 }
 0x252   :  { %3270 = vst.msk [vmem:[%s5319_s4 + $0xc4] sm:$0xf] %vm2055_vm1, %v3334_v41  ;;  %v3981_v47 = vadd.f32 %v3980_v45, %v3979_v42  ;;  %v3982_v48 = vpop.f32.mrb[166].mxu1  ;;  %v3871_v49 = vpop.f32.mrb[167].mxu0 }
 0x253   :  { %v3872_v50 = vadd.f32 %v3871_v49, %v3870_v46  ;;  %v3983_v51 = vpop.f32.mrb[167].mxu1 }
 0x254   :  { %v2741_v52 = vadd.f32 %v3981_v47, %v3869_v44  ;;  %v3984_v53 = vadd.f32 %v3983_v51, %v3982_v48 }
 0x256   :  { %v3335_v54 = vpack.c.bf16 %v2741_v52, %v2741_v52  ;;  %v2744_v55 = vadd.f32 %v3984_v53, %v3872_v50 }
 0x257   :  { %v3873_v56 = vpop.f32.mrb[168].mxu0 }
 0x258   :  { %3271 = vst.msk [vmem:[%s5319_s4 + $0xc8] sm:$0xf] %vm2055_vm1, %v3335_v54  ;;  %v3336_v57 = vpack.c.bf16 %v2744_v55, %v2744_v55  ;;  %v3985_v58 = vpop.f32.mrb[168].mxu1  ;;  %v3874_v59 = vpop.f32.mrb[169].mxu0 }
 0x259   :  { %v3875_v60 = vadd.f32 %v3874_v59, %v3873_v56  ;;  %v3986_v61 = vpop.f32.mrb[169].mxu1  ;;  %v3876_v62 = vpop.f32.mrb[170].mxu0 }
 0x25a   :  { %3272 = vst.msk [vmem:[%s5319_s4 + $0xcc] sm:$0xf] %vm2055_vm1, %v3336_v57  ;;  %v3987_v63 = vadd.f32 %v3986_v61, %v3985_v58  ;;  %v3988_v0 = vpop.f32.mrb[170].mxu1  ;;  %v3877_v1 = vpop.f32.mrb[171].mxu0 }
 0x25b   :  { %v3878_v2 = vadd.f32 %v3877_v1, %v3876_v62  ;;  %v3989_v33 = vpop.f32.mrb[171].mxu1 }
 0x25c   :  { %v2749_v34 = vadd.f32 %v3987_v63, %v3875_v60  ;;  %v3990_v35 = vadd.f32 %v3989_v33, %v3988_v0 }
 0x25e   :  { %v3337_v36 = vpack.c.bf16 %v2749_v34, %v2749_v34  ;;  %v2752_v3 = vadd.f32 %v3990_v35, %v3878_v2 }
 0x25f   :  { %v3879_v4 = vpop.f32.mrb[172].mxu0 }
 0x260   :  { %3273 = vst.msk [vmem:[%s5319_s4 + $0xd0] sm:$0xf] %vm2055_vm1, %v3337_v36  ;;  %v3338_v5 = vpack.c.bf16 %v2752_v3, %v2752_v3  ;;  %v3991_v6 = vpop.f32.mrb[172].mxu1  ;;  %v3880_v7 = vpop.f32.mrb[173].mxu0 }
 0x261   :  { %v3881_v8 = vadd.f32 %v3880_v7, %v3879_v4  ;;  %v3992_v9 = vpop.f32.mrb[173].mxu1  ;;  %v3882_v10 = vpop.f32.mrb[174].mxu0 }
 0x262   :  { %3274 = vst.msk [vmem:[%s5319_s4 + $0xd4] sm:$0xf] %vm2055_vm1, %v3338_v5  ;;  %v3993_v11 = vadd.f32 %v3992_v9, %v3991_v6  ;;  %v3994_v12 = vpop.f32.mrb[174].mxu1  ;;  %v3883_v13 = vpop.f32.mrb[175].mxu0 }
 0x263   :  { %v3884_v14 = vadd.f32 %v3883_v13, %v3882_v10  ;;  %v3995_v15 = vpop.f32.mrb[175].mxu1 }
 0x264   :  { %v2757_v16 = vadd.f32 %v3993_v11, %v3881_v8  ;;  %v3996_v17 = vadd.f32 %v3995_v15, %v3994_v12 }
 0x266   :  { %v3339_v18 = vpack.c.bf16 %v2757_v16, %v2757_v16  ;;  %v2760_v19 = vadd.f32 %v3996_v17, %v3884_v14 }
 0x267   :  { %v3885_v20 = vpop.f32.mrb[176].mxu0 }
 0x268   :  { %3275 = vst.msk [vmem:[%s5319_s4 + $0xd8] sm:$0xf] %vm2055_vm1, %v3339_v18  ;;  %v3340_v21 = vpack.c.bf16 %v2760_v19, %v2760_v19  ;;  %v3997_v22 = vpop.f32.mrb[176].mxu1  ;;  %v3886_v23 = vpop.f32.mrb[177].mxu0 }
 0x269   :  { %v3887_v24 = vadd.f32 %v3886_v23, %v3885_v20  ;;  %v3998_v25 = vpop.f32.mrb[177].mxu1  ;;  %v3888_v26 = vpop.f32.mrb[178].mxu0 }
 0x26a   :  { %3276 = vst.msk [vmem:[%s5319_s4 + $0xdc] sm:$0xf] %vm2055_vm1, %v3340_v21  ;;  %v3999_v27 = vadd.f32 %v3998_v25, %v3997_v22  ;;  %v4000_v28 = vpop.f32.mrb[178].mxu1  ;;  %v3889_v29 = vpop.f32.mrb[179].mxu0 }
 0x26b   :  { %v3890_v30 = vadd.f32 %v3889_v29, %v3888_v26  ;;  %v4001_v31 = vpop.f32.mrb[179].mxu1 }
 0x26c   :  { %v2765_v32 = vadd.f32 %v3999_v27, %v3887_v24  ;;  %v4002_v37 = vadd.f32 %v4001_v31, %v4000_v28 }
 0x26e   :  { %v3341_v38 = vpack.c.bf16 %v2765_v32, %v2765_v32  ;;  %v2768_v39 = vadd.f32 %v4002_v37, %v3890_v30 }
 0x26f   :  { %v3891_v40 = vpop.f32.mrb[180].mxu0 }
 0x270   :  { %3277 = vst.msk [vmem:[%s5319_s4 + $0xe0] sm:$0xf] %vm2055_vm1, %v3341_v38  ;;  %v3342_v41 = vpack.c.bf16 %v2768_v39, %v2768_v39  ;;  %v4003_v42 = vpop.f32.mrb[180].mxu1  ;;  %v3892_v43 = vpop.f32.mrb[181].mxu0 }
 0x271   :  { %v3893_v44 = vadd.f32 %v3892_v43, %v3891_v40  ;;  %v4004_v45 = vpop.f32.mrb[181].mxu1  ;;  %v3894_v46 = vpop.f32.mrb[182].mxu0 }
 0x272   :  { %3278 = vst.msk [vmem:[%s5319_s4 + $0xe4] sm:$0xf] %vm2055_vm1, %v3342_v41  ;;  %v4005_v47 = vadd.f32 %v4004_v45, %v4003_v42  ;;  %v4006_v48 = vpop.f32.mrb[182].mxu1  ;;  %v3895_v49 = vpop.f32.mrb[183].mxu0 }
 0x273   :  { %v3896_v50 = vadd.f32 %v3895_v49, %v3894_v46  ;;  %v4007_v51 = vpop.f32.mrb[183].mxu1 }
 0x274   :  { %v2773_v52 = vadd.f32 %v4005_v47, %v3893_v44  ;;  %v4008_v53 = vadd.f32 %v4007_v51, %v4006_v48 }
 0x276   :  { %v3343_v54 = vpack.c.bf16 %v2773_v52, %v2773_v52  ;;  %v2776_v55 = vadd.f32 %v4008_v53, %v3896_v50 }
 0x277   :  { %v3897_v56 = vpop.f32.mrb[184].mxu0 }
 0x278   :  { %3279 = vst.msk [vmem:[%s5319_s4 + $0xe8] sm:$0xf] %vm2055_vm1, %v3343_v54  ;;  %v3344_v57 = vpack.c.bf16 %v2776_v55, %v2776_v55  ;;  %v4009_v58 = vpop.f32.mrb[184].mxu1  ;;  %v3898_v59 = vpop.f32.mrb[185].mxu0 }
 0x279   :  { %v3899_v60 = vadd.f32 %v3898_v59, %v3897_v56  ;;  %v4010_v61 = vpop.f32.mrb[185].mxu1  ;;  %v3900_v62 = vpop.f32.mrb[186].mxu0 }
 0x27a   :  { %3280 = vst.msk [vmem:[%s5319_s4 + $0xec] sm:$0xf] %vm2055_vm1, %v3344_v57  ;;  %v4011_v63 = vadd.f32 %v4010_v61, %v4009_v58  ;;  %v4012_v0 = vpop.f32.mrb[186].mxu1  ;;  %v3901_v1 = vpop.f32.mrb[187].mxu0 }
 0x27b   :  { %v3902_v2 = vadd.f32 %v3901_v1, %v3900_v62  ;;  %v4013_v33 = vpop.f32.mrb[187].mxu1 }
 0x27c   :  { %v2781_v34 = vadd.f32 %v4011_v63, %v3899_v60  ;;  %v4014_v35 = vadd.f32 %v4013_v33, %v4012_v0 }
 0x27e   :  { %v3345_v36 = vpack.c.bf16 %v2781_v34, %v2781_v34  ;;  %v2784_v3 = vadd.f32 %v4014_v35, %v3902_v2 }
 0x27f   :  { %v3903_v4 = vpop.f32.mrb[188].mxu0 }
 0x280   :  { %3281 = vst.msk [vmem:[%s5319_s4 + $0xf0] sm:$0xf] %vm2055_vm1, %v3345_v36  ;;  %v3346_v5 = vpack.c.bf16 %v2784_v3, %v2784_v3  ;;  %v4015_v6 = vpop.f32.mrb[188].mxu1  ;;  %v3904_v7 = vpop.f32.mrb[189].mxu0 }
 0x281   :  { %v3905_v8 = vadd.f32 %v3904_v7, %v3903_v4  ;;  %v4016_v9 = vpop.f32.mrb[189].mxu1  ;;  %v3906_v10 = vpop.f32.mrb[190].mxu0 }
 0x282   :  { %3282 = vst.msk [vmem:[%s5319_s4 + $0xf4] sm:$0xf] %vm2055_vm1, %v3346_v5  ;;  %v4017_v11 = vadd.f32 %v4016_v9, %v4015_v6  ;;  %v4018_v12 = vpop.f32.mrb[190].mxu1  ;;  %v3907_v13 = vpop.f32.mrb[191].mxu0 }
 0x283   :  { %v3908_v14 = vadd.f32 %v3907_v13, %v3906_v10  ;;  %v4019_v15 = vpop.f32.mrb[191].mxu1 }
 0x284   :  { %v2789_v16 = vadd.f32 %v4017_v11, %v3905_v8  ;;  %v4020_v17 = vadd.f32 %v4019_v15, %v4018_v12 }
 0x286   :  { %v3347_v18 = vpack.c.bf16 %v2789_v16, %v2789_v16  ;;  %v2792_v19 = vadd.f32 %v4020_v17, %v3908_v14 }
 0x288   :  { %3283 = vst.msk [vmem:[%s5319_s4 + $0xf8] sm:$0xf] %vm2055_vm1, %v3347_v18  ;;  %v3348_v20 = vpack.c.bf16 %v2792_v19, %v2792_v19 }
 0x28a   :  { %3284 = vst.msk [vmem:[%s5319_s4 + $0xfc] sm:$0xf] %vm2055_vm1, %v3348_v20 }
 0x28b   :  { %2964 = vsyncpa [#allocation3], 1 }

</bundles_post_ra>
